<compile_context>
chip_gen: v6e
topology: v6e:2x2x1
jax: 0.10.0
libtpu: 0.0.40
codegen_flags: <defaults>
</compile_context>

<pallas_src>
import functools

import jax
import jax.numpy as jnp
from jax.experimental import pallas as pl
from jax.experimental.pallas import tpu as pltpu

VMEM = pltpu.MemorySpace.VMEM


def _vmem_specs(n):
    return [pl.BlockSpec(memory_space=VMEM) for _ in range(n)]


# ----------------------------- Pallas kernels -----------------------------

def gat_layer_kernel(x_ref, adj_ref, lin_wT_ref, lin_b_ref,
                     attl_blk_ref, attr_blk_ref,
                     finx_wT_ref, fina_wT_ref, fin_b_ref, out_ref,
                     *, heads, out_channels, negative_slope):
    # x:        [N, F]           node features
    # adj:      [N_dst, N_src]   1.0 where edge src -> dst exists (else 0.0)
    # lin_wT:   [F, H*C]         lin_l weight, pre-transposed
    # lin_b:    [1, H*C]
    # attl_blk: [H*C, H]         block-diagonal att_l (alpha_l = w @ attl_blk)
    # attr_blk: [H*C, H]         block-diagonal att_r
    # finx_wT:  [F, H*C]         final_lin weight, x-columns, pre-transposed
    # fina_wT:  [H*C, H*C]       final_lin weight, agg-columns, pre-transposed
    # fin_b:    [1, H*C]
    # out:      [N, H*C]         relu(final_lin(cat(x, agg)))   (lane-dense)
    x = x_ref[...]
    adj = adj_ref[...]
    c = out_channels

    # lin_l(x)  (lin_r is the same shared module)
    w = (jnp.dot(x, lin_wT_ref[...], preferred_element_type=jnp.float32)
         + lin_b_ref[...])                                                 # [N, H*C]

    # attention logits for all heads in two MXU matmuls (no XLU reductions)
    alpha_r = jnp.dot(w, attr_blk_ref[...],
                      preferred_element_type=jnp.float32)                  # [N, H]
    alpha_l = jnp.dot(w, attl_blk_ref[...],
                      preferred_element_type=jnp.float32)                  # [N, H]
    alpha_lT = jnp.transpose(alpha_l)                                      # [H, N] (XLU)

    # final_lin: x contribution + bias; agg contributions accumulated below
    y = (jnp.dot(x, finx_wT_ref[...], preferred_element_type=jnp.float32)
         + fin_b_ref[...])                                                 # [N, H*C]

    fina_wT = fina_wT_ref[...]
    for h in range(heads):                     # heads is small & static
        wl_h = w[:, h * c:(h + 1) * c]                         # [N, C]
        scores = alpha_r[:, h:h + 1] + alpha_lT[h:h + 1, :]    # [N_dst, N_src]
        scores = jnp.where(scores > 0, scores, negative_slope * scores)
        scores = jnp.where(adj > 0, scores, -1e30)             # f32 mask constant
        m = jnp.max(scores, axis=1, keepdims=True)
        p = jnp.exp(scores - m) * adj
        denom = jnp.sum(p, axis=1, keepdims=True)
        denom = jnp.where(denom > 0, denom, 1.0)               # isolated dst -> 0 out
        attn = p * pl.reciprocal(denom, approx=True)           # EUP, not VPU divide
        # scatter-sum over neighbours == dense attn @ (W_l x)_h, then fold
        # straight into final_lin's agg-part (no concat, no [H,N,C] output).
        agg_h = jnp.dot(attn, wl_h, preferred_element_type=jnp.float32)    # [N, C]
        y = y + jnp.dot(agg_h, fina_wT[h * c:(h + 1) * c, :],
                        preferred_element_type=jnp.float32)
    # ReLU from GNNStack.forward fused here
    out_ref[...] = jnp.maximum(y, 0.0)


def post_mp_kernel(x_ref, w1T_ref, b1_ref, w2T_ref, b2_ref, o_ref):
    # post_mp: Linear -> (Dropout: identity in eval) -> Linear, then log_softmax.
    h = (jnp.dot(x_ref[...], w1T_ref[...], preferred_element_type=jnp.float32)
         + b1_ref[...])
    z = (jnp.dot(h, w2T_ref[...], preferred_element_type=jnp.float32)
         + b2_ref[...])
    m = jnp.max(z, axis=1, keepdims=True)
    s = z - m
    lse = jnp.log(jnp.sum(jnp.exp(s), axis=1, keepdims=True))
    o_ref[...] = s - lse


# ----------------------------- wrappers -----------------------------

def gat_layer_pallas(x, adj, p, heads, out_channels, negative_slope=0.2):
    n = x.shape[0]
    hc = heads * out_channels
    kern = functools.partial(gat_layer_kernel, heads=heads,
                             out_channels=out_channels,
                             negative_slope=negative_slope)
    return pl.pallas_call(
        kern,
        out_shape=jax.ShapeDtypeStruct((n, hc), jnp.float32),
        in_specs=_vmem_specs(9),
        out_specs=pl.BlockSpec(memory_space=VMEM),
    )(x, adj, p["lin_wT"], p["lin_b"], p["attl_blk"], p["attr_blk"],
      p["finx_wT"], p["fina_wT"], p["fin_b"])


def gnn_stack_forward(x, adj, prepped, heads, hidden_dim):
    # dropout is identity in eval mode
    for lp in prepped["convs"]:
        x = gat_layer_pallas(x, adj, lp, heads, hidden_dim)
    n = x.shape[0]
    out_dim = prepped["post_w2T"].shape[1]
    return pl.pallas_call(
        post_mp_kernel,
        out_shape=jax.ShapeDtypeStruct((n, out_dim), jnp.float32),
        in_specs=_vmem_specs(5),
        out_specs=pl.BlockSpec(memory_space=VMEM),
    )(x, prepped["post_w1T"], prepped["post_b1"],
      prepped["post_w2T"], prepped["post_b2"])


# ----------------------------- parameter init -----------------------------

def _xavier(key, shape):
    fan_out, fan_in = shape[0], shape[-1]
    bound = (6.0 / (fan_in + fan_out)) ** 0.5
    return jax.random.uniform(key, shape, jnp.float32, -bound, bound)


def _bias(key, fan_in, size):
    bound = 1.0 / (fan_in ** 0.5)
    return jax.random.uniform(key, (size,), jnp.float32, -bound, bound)


def init_gat_params(key, in_channels, out_channels, heads):
    ks = jax.random.split(key, 6)
    hc = heads * out_channels
    return {
        "lin_w": _xavier(ks[0], (hc, in_channels)),
        "lin_b": _bias(ks[1], in_channels, hc),
        "att_l": _xavier(ks[2], (heads, out_channels)),
        "att_r": _xavier(ks[3], (heads, out_channels)),
        "fin_w": _xavier(ks[4], (hc, in_channels + hc)),
        "fin_b": _bias(ks[5], in_channels + hc, hc),
    }


def init_gnn_stack(key, input_dim, hidden_dim, output_dim, heads, num_layers):
    keys = jax.random.split(key, num_layers + 4)
    convs = [init_gat_params(keys[0], input_dim, hidden_dim, heads)]
    for l in range(num_layers - 1):
        convs.append(init_gat_params(keys[l + 1], heads * hidden_dim,
                                     hidden_dim, heads))
    return {
        "convs": convs,
        "post_w1": _xavier(keys[-4], (hidden_dim, heads * hidden_dim)),
        "post_b1": _bias(keys[-3], heads * hidden_dim, hidden_dim),
        "post_w2": _xavier(keys[-2], (output_dim, hidden_dim)),
        "post_b2": _bias(keys[-1], hidden_dim, output_dim),
    }


def _block_diag_att(att):
    # att: [H, C]  ->  [H*C, H] with blk[h*C + c, h] = att[h, c]
    heads, c = att.shape
    hc = heads * c
    rows = jnp.arange(hc)
    cols = rows // c
    return jnp.zeros((hc, heads), jnp.float32).at[rows, cols].set(att.reshape(-1))


def prepare_pallas_params(params, heads, hidden_dim):
    # One-time relayout of weights into kernel-ready form (pre-transposed
    # matmul operands, [1, M] biases, block-diag att, final_lin split into
    # x-part / agg-part) so the forward pass has zero per-call transposes.
    hc = heads * hidden_dim
    convs = []
    for lp in params["convs"]:
        f_in = lp["lin_w"].shape[1]
        convs.append({
            "lin_wT": lp["lin_w"].T,
            "lin_b": lp["lin_b"].reshape(1, hc),
            "attl_blk": _block_diag_att(lp["att_l"]),
            "attr_blk": _block_diag_att(lp["att_r"]),
            "finx_wT": lp["fin_w"][:, :f_in].T,
            "fina_wT": lp["fin_w"][:, f_in:].T,
            "fin_b": lp["fin_b"].reshape(1, hc),
        })
    return {
        "convs": convs,
        "post_w1T": params["post_w1"].T,
        "post_b1": params["post_b1"].reshape(1, -1),
        "post_w2T": params["post_w2"].T,
        "post_b2": params["post_b2"].reshape(1, -1),
    }


# ----------------------- pure-JAX reference (edge-list form) -----------------

def gat_ref(x, edge_index, params, heads, c, neg_slope=0.2):
    src, dst = edge_index[0], edge_index[1]
    n = x.shape[0]
    w = x @ params["lin_w"].T + params["lin_b"]
    wl = w.reshape(n, heads, c)
    alpha_l = (wl * params["att_l"][None]).sum(-1)
    alpha_r = (wl * params["att_r"][None]).sum(-1)
    e = alpha_l[src] + alpha_r[dst]
    e = jnp.where(e > 0, e, neg_slope * e)
    emax = jax.ops.segment_max(e, dst, num_segments=n)[dst]
    p = jnp.exp(e - emax)
    denom = jax.ops.segment_sum(p, dst, num_segments=n)[dst]
    attn = p / denom
    msg = wl[src] * attn[:, :, None]
    out = jax.ops.segment_sum(msg, dst, num_segments=n).reshape(n, heads * c)
    cat = jnp.concatenate([x, out], axis=1)
    return cat @ params["fin_w"].T + params["fin_b"]


def gnn_stack_ref(x, edge_index, params, heads, hidden_dim):
    for lp in params["convs"]:
        x = jax.nn.relu(gat_ref(x, edge_index, lp, heads, hidden_dim))
    x = x @ params["post_w1"].T + params["post_b1"]
    x = x @ params["post_w2"].T + params["post_b2"]
    return jax.nn.log_softmax(x, axis=1)


# ----------------------------- main -----------------------------

if __name__ == "__main__":
    # small deterministic problem
    N = 16           # number of graph nodes
    INPUT_DIM = 16
    HIDDEN_DIM = 32
    OUTPUT_DIM = 8
    HEADS = 2
    NUM_LAYERS = 2

    key = jax.random.PRNGKey(0)
    kx, kp = jax.random.split(key)
    x = jax.random.normal(kx, (N, INPUT_DIM), jnp.float32)

    # deterministic edge list (src -> dst), in-degree 2 everywhere, no duplicates
    src = jnp.concatenate([jnp.arange(N), jnp.arange(N)])
    dst = jnp.concatenate([(jnp.arange(N) + 1) % N, (jnp.arange(N) + 3) % N])
    edge_index = jnp.stack([src, dst]).astype(jnp.int32)          # [2, E]

    # dense adjacency mask used by the fused Pallas GAT kernel
    adj = jnp.zeros((N, N), jnp.float32).at[dst, src].set(1.0)    # [N_dst, N_src]

    params = init_gnn_stack(kp, INPUT_DIM, HIDDEN_DIM, OUTPUT_DIM,
                            HEADS, NUM_LAYERS)
    prepped = prepare_pallas_params(params, HEADS, HIDDEN_DIM)

    fwd = jax.jit(functools.partial(gnn_stack_forward,
                                    heads=HEADS, hidden_dim=HIDDEN_DIM))
    out = jax.block_until_ready(fwd(x, adj, prepped))

    ref = gnn_stack_ref(x, edge_index, params, HEADS, HIDDEN_DIM)
    assert out.shape == (N, OUTPUT_DIM)
    # approx reciprocal (EUP) in the softmax -> slightly looser tolerance than
    # the exact-f32 reference.
    assert jnp.allclose(out, ref, rtol=2e-3, atol=2e-3), (
        float(jnp.max(jnp.abs(out - ref))))

    print("KERNEL_OK")
</pallas_src>

<mosaic_0001>
module attributes {stable_mosaic.version = 11 : i64} {
  func.func @gat_layer_kernel(%arg0: memref<16x64xf32, #tpu.memory_space<vmem>>, %arg1: memref<16x16xf32, #tpu.memory_space<vmem>>, %arg2: memref<64x64xf32, #tpu.memory_space<vmem>>, %arg3: memref<1x64xf32, #tpu.memory_space<vmem>>, %arg4: memref<64x2xf32, #tpu.memory_space<vmem>>, %arg5: memref<64x2xf32, #tpu.memory_space<vmem>>, %arg6: memref<64x64xf32, #tpu.memory_space<vmem>>, %arg7: memref<64x64xf32, #tpu.memory_space<vmem>>, %arg8: memref<1x64xf32, #tpu.memory_space<vmem>>, %arg9: memref<16x64xf32, #tpu.memory_space<vmem>>) attributes {dimension_semantics = [], scalar_prefetch = 0 : i64, scratch_operands = 0 : i64, tpu.core_type = #tpu.core_type<tc>} {
    %c0 = arith.constant 0 : index
    %c0_0 = arith.constant 0 : index
    %0 = vector.load %arg0[%c0, %c0_0] : memref<16x64xf32, #tpu.memory_space<vmem>>, vector<16x64xf32>
    %c0_1 = arith.constant 0 : index
    %c0_2 = arith.constant 0 : index
    %1 = vector.load %arg1[%c0_1, %c0_2] : memref<16x16xf32, #tpu.memory_space<vmem>>, vector<16x16xf32>
    %c0_3 = arith.constant 0 : index
    %c0_4 = arith.constant 0 : index
    %2 = vector.load %arg2[%c0_3, %c0_4] : memref<64x64xf32, #tpu.memory_space<vmem>>, vector<64x64xf32>
    %cst = arith.constant dense<0.000000e+00> : vector<16x64xf32>
    %3 = tpu.matmul %0, %2, %cst {dimension_numbers = #tpu.dot_dimension_numbers<[1], [0], [0], [1], [0, 0, 1, 1], [], []>} : vector<16x64xf32>, vector<64x64xf32>, vector<16x64xf32> -> vector<16x64xf32>
    %c0_5 = arith.constant 0 : index
    %c0_6 = arith.constant 0 : index
    %4 = vector.load %arg3[%c0_5, %c0_6] : memref<1x64xf32, #tpu.memory_space<vmem>>, vector<1x64xf32>
    %5 = vector.broadcast %4 : vector<1x64xf32> to vector<16x64xf32>
    %6 = arith.addf %3, %5 : vector<16x64xf32>
    %c0_7 = arith.constant 0 : index
    %c0_8 = arith.constant 0 : index
    %7 = vector.load %arg5[%c0_7, %c0_8] : memref<64x2xf32, #tpu.memory_space<vmem>>, vector<64x2xf32>
    %cst_9 = arith.constant dense<0.000000e+00> : vector<16x2xf32>
    %8 = tpu.matmul %6, %7, %cst_9 {dimension_numbers = #tpu.dot_dimension_numbers<[1], [0], [0], [1], [0, 0, 1, 1], [], []>} : vector<16x64xf32>, vector<64x2xf32>, vector<16x2xf32> -> vector<16x2xf32>
    %c0_10 = arith.constant 0 : index
    %c0_11 = arith.constant 0 : index
    %9 = vector.load %arg4[%c0_10, %c0_11] : memref<64x2xf32, #tpu.memory_space<vmem>>, vector<64x2xf32>
    %cst_12 = arith.constant dense<0.000000e+00> : vector<16x2xf32>
    %10 = tpu.matmul %6, %9, %cst_12 {dimension_numbers = #tpu.dot_dimension_numbers<[1], [0], [0], [1], [0, 0, 1, 1], [], []>} : vector<16x64xf32>, vector<64x2xf32>, vector<16x2xf32> -> vector<16x2xf32>
    %11 = tpu.transpose %10, [1, 0] : vector<16x2xf32> -> vector<2x16xf32>
    %c0_13 = arith.constant 0 : index
    %c0_14 = arith.constant 0 : index
    %12 = vector.load %arg6[%c0_13, %c0_14] : memref<64x64xf32, #tpu.memory_space<vmem>>, vector<64x64xf32>
    %cst_15 = arith.constant dense<0.000000e+00> : vector<16x64xf32>
    %13 = tpu.matmul %0, %12, %cst_15 {dimension_numbers = #tpu.dot_dimension_numbers<[1], [0], [0], [1], [0, 0, 1, 1], [], []>} : vector<16x64xf32>, vector<64x64xf32>, vector<16x64xf32> -> vector<16x64xf32>
    %c0_16 = arith.constant 0 : index
    %c0_17 = arith.constant 0 : index
    %14 = vector.load %arg8[%c0_16, %c0_17] : memref<1x64xf32, #tpu.memory_space<vmem>>, vector<1x64xf32>
    %15 = vector.broadcast %14 : vector<1x64xf32> to vector<16x64xf32>
    %16 = arith.addf %13, %15 : vector<16x64xf32>
    %c0_18 = arith.constant 0 : index
    %c0_19 = arith.constant 0 : index
    %17 = vector.load %arg7[%c0_18, %c0_19] : memref<64x64xf32, #tpu.memory_space<vmem>>, vector<64x64xf32>
    %18 = vector.extract_strided_slice %6 {offsets = [0, 0], sizes = [16, 32], strides = [1, 1]} : vector<16x64xf32> to vector<16x32xf32>
    %19 = vector.extract_strided_slice %8 {offsets = [0, 0], sizes = [16, 1], strides = [1, 1]} : vector<16x2xf32> to vector<16x1xf32>
    %20 = vector.extract_strided_slice %11 {offsets = [0, 0], sizes = [1, 16], strides = [1, 1]} : vector<2x16xf32> to vector<1x16xf32>
    %21 = vector.broadcast %19 : vector<16x1xf32> to vector<16x16xf32>
    %22 = vector.broadcast %20 : vector<1x16xf32> to vector<16x16xf32>
    %23 = arith.addf %21, %22 : vector<16x16xf32>
    %cst_20 = arith.constant 0.000000e+00 : f32
    %24 = vector.broadcast %cst_20 : f32 to vector<16x16xf32>
    %25 = arith.cmpf ogt, %23, %24 : vector<16x16xf32>
    %cst_21 = arith.constant 2.000000e-01 : f32
    %26 = vector.broadcast %cst_21 : f32 to vector<16x16xf32>
    %27 = arith.mulf %26, %23 : vector<16x16xf32>
    %28 = arith.select %25, %23, %27 : vector<16x16xi1>, vector<16x16xf32>
    %cst_22 = arith.constant 0.000000e+00 : f32
    %29 = vector.broadcast %cst_22 : f32 to vector<16x16xf32>
    %30 = arith.cmpf ogt, %1, %29 : vector<16x16xf32>
    %cst_23 = arith.constant -1.000000e+30 : f32
    %31 = vector.broadcast %cst_23 : f32 to vector<16x16xf32>
    %32 = arith.select %30, %28, %31 : vector<16x16xi1>, vector<16x16xf32>
    %cst_24 = arith.constant dense<0xFF800000> : vector<16xf32>
    %33 = vector.multi_reduction <maximumf>, %32, %cst_24 [1] : vector<16x16xf32> to vector<16xf32>
    %34 = vector.shape_cast %33 : vector<16xf32> to vector<16x1xf32>
    %35 = vector.broadcast %34 : vector<16x1xf32> to vector<16x16xf32>
    %36 = arith.subf %32, %35 : vector<16x16xf32>
    %37 = math.exp %36 : vector<16x16xf32>
    %38 = arith.mulf %37, %1 : vector<16x16xf32>
    %cst_25 = arith.constant dense<0.000000e+00> : vector<16xf32>
    %39 = vector.multi_reduction <add>, %38, %cst_25 [1] : vector<16x16xf32> to vector<16xf32>
    %40 = vector.shape_cast %39 : vector<16xf32> to vector<16x1xf32>
    %cst_26 = arith.constant 0.000000e+00 : f32
    %41 = vector.broadcast %cst_26 : f32 to vector<16x1xf32>
    %42 = arith.cmpf ogt, %40, %41 : vector<16x1xf32>
    %cst_27 = arith.constant 1.000000e+00 : f32
    %43 = vector.broadcast %cst_27 : f32 to vector<16x1xf32>
    %44 = arith.select %42, %40, %43 : vector<16x1xi1>, vector<16x1xf32>
    %45 = tpu.reciprocal %44 {approx = true} : vector<16x1xf32> -> vector<16x1xf32>
    %46 = vector.broadcast %45 : vector<16x1xf32> to vector<16x16xf32>
    %47 = arith.mulf %38, %46 : vector<16x16xf32>
    %cst_28 = arith.constant dense<0.000000e+00> : vector<16x32xf32>
    %48 = tpu.matmul %47, %18, %cst_28 {dimension_numbers = #tpu.dot_dimension_numbers<[1], [0], [0], [1], [0, 0, 1, 1], [], []>} : vector<16x16xf32>, vector<16x32xf32>, vector<16x32xf32> -> vector<16x32xf32>
    %49 = vector.extract_strided_slice %17 {offsets = [0, 0], sizes = [32, 64], strides = [1, 1]} : vector<64x64xf32> to vector<32x64xf32>
    %cst_29 = arith.constant dense<0.000000e+00> : vector<16x64xf32>
    %50 = tpu.matmul %48, %49, %cst_29 {dimension_numbers = #tpu.dot_dimension_numbers<[1], [0], [0], [1], [0, 0, 1, 1], [], []>} : vector<16x32xf32>, vector<32x64xf32>, vector<16x64xf32> -> vector<16x64xf32>
    %51 = arith.addf %16, %50 : vector<16x64xf32>
    %52 = vector.extract_strided_slice %6 {offsets = [0, 32], sizes = [16, 32], strides = [1, 1]} : vector<16x64xf32> to vector<16x32xf32>
    %53 = vector.extract_strided_slice %8 {offsets = [0, 1], sizes = [16, 1], strides = [1, 1]} : vector<16x2xf32> to vector<16x1xf32>
    %54 = vector.extract_strided_slice %11 {offsets = [1, 0], sizes = [1, 16], strides = [1, 1]} : vector<2x16xf32> to vector<1x16xf32>
    %55 = vector.broadcast %53 : vector<16x1xf32> to vector<16x16xf32>
    %56 = vector.broadcast %54 : vector<1x16xf32> to vector<16x16xf32>
    %57 = arith.addf %55, %56 : vector<16x16xf32>
    %cst_30 = arith.constant 0.000000e+00 : f32
    %58 = vector.broadcast %cst_30 : f32 to vector<16x16xf32>
    %59 = arith.cmpf ogt, %57, %58 : vector<16x16xf32>
    %cst_31 = arith.constant 2.000000e-01 : f32
    %60 = vector.broadcast %cst_31 : f32 to vector<16x16xf32>
    %61 = arith.mulf %60, %57 : vector<16x16xf32>
    %62 = arith.select %59, %57, %61 : vector<16x16xi1>, vector<16x16xf32>
    %cst_32 = arith.constant 0.000000e+00 : f32
    %63 = vector.broadcast %cst_32 : f32 to vector<16x16xf32>
    %64 = arith.cmpf ogt, %1, %63 : vector<16x16xf32>
    %cst_33 = arith.constant -1.000000e+30 : f32
    %65 = vector.broadcast %cst_33 : f32 to vector<16x16xf32>
    %66 = arith.select %64, %62, %65 : vector<16x16xi1>, vector<16x16xf32>
    %cst_34 = arith.constant dense<0xFF800000> : vector<16xf32>
    %67 = vector.multi_reduction <maximumf>, %66, %cst_34 [1] : vector<16x16xf32> to vector<16xf32>
    %68 = vector.shape_cast %67 : vector<16xf32> to vector<16x1xf32>
    %69 = vector.broadcast %68 : vector<16x1xf32> to vector<16x16xf32>
    %70 = arith.subf %66, %69 : vector<16x16xf32>
    %71 = math.exp %70 : vector<16x16xf32>
    %72 = arith.mulf %71, %1 : vector<16x16xf32>
    %cst_35 = arith.constant dense<0.000000e+00> : vector<16xf32>
    %73 = vector.multi_reduction <add>, %72, %cst_35 [1] : vector<16x16xf32> to vector<16xf32>
    %74 = vector.shape_cast %73 : vector<16xf32> to vector<16x1xf32>
    %cst_36 = arith.constant 0.000000e+00 : f32
    %75 = vector.broadcast %cst_36 : f32 to vector<16x1xf32>
    %76 = arith.cmpf ogt, %74, %75 : vector<16x1xf32>
    %cst_37 = arith.constant 1.000000e+00 : f32
    %77 = vector.broadcast %cst_37 : f32 to vector<16x1xf32>
    %78 = arith.select %76, %74, %77 : vector<16x1xi1>, vector<16x1xf32>
    %79 = tpu.reciprocal %78 {approx = true} : vector<16x1xf32> -> vector<16x1xf32>
    %80 = vector.broadcast %79 : vector<16x1xf32> to vector<16x16xf32>
    %81 = arith.mulf %72, %80 : vector<16x16xf32>
    %cst_38 = arith.constant dense<0.000000e+00> : vector<16x32xf32>
    %82 = tpu.matmul %81, %52, %cst_38 {dimension_numbers = #tpu.dot_dimension_numbers<[1], [0], [0], [1], [0, 0, 1, 1], [], []>} : vector<16x16xf32>, vector<16x32xf32>, vector<16x32xf32> -> vector<16x32xf32>
    %83 = vector.extract_strided_slice %17 {offsets = [32, 0], sizes = [32, 64], strides = [1, 1]} : vector<64x64xf32> to vector<32x64xf32>
    %cst_39 = arith.constant dense<0.000000e+00> : vector<16x64xf32>
    %84 = tpu.matmul %82, %83, %cst_39 {dimension_numbers = #tpu.dot_dimension_numbers<[1], [0], [0], [1], [0, 0, 1, 1], [], []>} : vector<16x32xf32>, vector<32x64xf32>, vector<16x64xf32> -> vector<16x64xf32>
    %85 = arith.addf %51, %84 : vector<16x64xf32>
    %cst_40 = arith.constant 0.000000e+00 : f32
    %86 = vector.broadcast %cst_40 : f32 to vector<16x64xf32>
    %87 = arith.maximumf %85, %86 : vector<16x64xf32>
    %c0_41 = arith.constant 0 : index
    %c0_42 = arith.constant 0 : index
    %88 = vector.load %arg9[%c0_41, %c0_42] : memref<16x64xf32, #tpu.memory_space<vmem>>, vector<16x64xf32>
    tpu.vector_store %arg9[%c0_41, %c0_42], %87 {strides = array<i32>} : memref<16x64xf32, #tpu.memory_space<vmem>>, vector<16x64xf32>,
    return
  }
}

module attributes {stable_mosaic.version = 11 : i64} {
  func.func @gat_layer_kernel(%arg0: memref<16x16xf32, #tpu.memory_space<vmem>>, %arg1: memref<16x16xf32, #tpu.memory_space<vmem>>, %arg2: memref<16x64xf32, #tpu.memory_space<vmem>>, %arg3: memref<1x64xf32, #tpu.memory_space<vmem>>, %arg4: memref<64x2xf32, #tpu.memory_space<vmem>>, %arg5: memref<64x2xf32, #tpu.memory_space<vmem>>, %arg6: memref<16x64xf32, #tpu.memory_space<vmem>>, %arg7: memref<64x64xf32, #tpu.memory_space<vmem>>, %arg8: memref<1x64xf32, #tpu.memory_space<vmem>>, %arg9: memref<16x64xf32, #tpu.memory_space<vmem>>) attributes {dimension_semantics = [], scalar_prefetch = 0 : i64, scratch_operands = 0 : i64, tpu.core_type = #tpu.core_type<tc>} {
    %c0 = arith.constant 0 : index
    %c0_0 = arith.constant 0 : index
    %0 = vector.load %arg0[%c0, %c0_0] : memref<16x16xf32, #tpu.memory_space<vmem>>, vector<16x16xf32>
    %c0_1 = arith.constant 0 : index
    %c0_2 = arith.constant 0 : index
    %1 = vector.load %arg1[%c0_1, %c0_2] : memref<16x16xf32, #tpu.memory_space<vmem>>, vector<16x16xf32>
    %c0_3 = arith.constant 0 : index
    %c0_4 = arith.constant 0 : index
    %2 = vector.load %arg2[%c0_3, %c0_4] : memref<16x64xf32, #tpu.memory_space<vmem>>, vector<16x64xf32>
    %cst = arith.constant dense<0.000000e+00> : vector<16x64xf32>
    %3 = tpu.matmul %0, %2, %cst {dimension_numbers = #tpu.dot_dimension_numbers<[1], [0], [0], [1], [0, 0, 1, 1], [], []>} : vector<16x16xf32>, vector<16x64xf32>, vector<16x64xf32> -> vector<16x64xf32>
    %c0_5 = arith.constant 0 : index
    %c0_6 = arith.constant 0 : index
    %4 = vector.load %arg3[%c0_5, %c0_6] : memref<1x64xf32, #tpu.memory_space<vmem>>, vector<1x64xf32>
    %5 = vector.broadcast %4 : vector<1x64xf32> to vector<16x64xf32>
    %6 = arith.addf %3, %5 : vector<16x64xf32>
    %c0_7 = arith.constant 0 : index
    %c0_8 = arith.constant 0 : index
    %7 = vector.load %arg5[%c0_7, %c0_8] : memref<64x2xf32, #tpu.memory_space<vmem>>, vector<64x2xf32>
    %cst_9 = arith.constant dense<0.000000e+00> : vector<16x2xf32>
    %8 = tpu.matmul %6, %7, %cst_9 {dimension_numbers = #tpu.dot_dimension_numbers<[1], [0], [0], [1], [0, 0, 1, 1], [], []>} : vector<16x64xf32>, vector<64x2xf32>, vector<16x2xf32> -> vector<16x2xf32>
    %c0_10 = arith.constant 0 : index
    %c0_11 = arith.constant 0 : index
    %9 = vector.load %arg4[%c0_10, %c0_11] : memref<64x2xf32, #tpu.memory_space<vmem>>, vector<64x2xf32>
    %cst_12 = arith.constant dense<0.000000e+00> : vector<16x2xf32>
    %10 = tpu.matmul %6, %9, %cst_12 {dimension_numbers = #tpu.dot_dimension_numbers<[1], [0], [0], [1], [0, 0, 1, 1], [], []>} : vector<16x64xf32>, vector<64x2xf32>, vector<16x2xf32> -> vector<16x2xf32>
    %11 = tpu.transpose %10, [1, 0] : vector<16x2xf32> -> vector<2x16xf32>
    %c0_13 = arith.constant 0 : index
    %c0_14 = arith.constant 0 : index
    %12 = vector.load %arg6[%c0_13, %c0_14] : memref<16x64xf32, #tpu.memory_space<vmem>>, vector<16x64xf32>
    %cst_15 = arith.constant dense<0.000000e+00> : vector<16x64xf32>
    %13 = tpu.matmul %0, %12, %cst_15 {dimension_numbers = #tpu.dot_dimension_numbers<[1], [0], [0], [1], [0, 0, 1, 1], [], []>} : vector<16x16xf32>, vector<16x64xf32>, vector<16x64xf32> -> vector<16x64xf32>
    %c0_16 = arith.constant 0 : index
    %c0_17 = arith.constant 0 : index
    %14 = vector.load %arg8[%c0_16, %c0_17] : memref<1x64xf32, #tpu.memory_space<vmem>>, vector<1x64xf32>
    %15 = vector.broadcast %14 : vector<1x64xf32> to vector<16x64xf32>
    %16 = arith.addf %13, %15 : vector<16x64xf32>
    %c0_18 = arith.constant 0 : index
    %c0_19 = arith.constant 0 : index
    %17 = vector.load %arg7[%c0_18, %c0_19] : memref<64x64xf32, #tpu.memory_space<vmem>>, vector<64x64xf32>
    %18 = vector.extract_strided_slice %6 {offsets = [0, 0], sizes = [16, 32], strides = [1, 1]} : vector<16x64xf32> to vector<16x32xf32>
    %19 = vector.extract_strided_slice %8 {offsets = [0, 0], sizes = [16, 1], strides = [1, 1]} : vector<16x2xf32> to vector<16x1xf32>
    %20 = vector.extract_strided_slice %11 {offsets = [0, 0], sizes = [1, 16], strides = [1, 1]} : vector<2x16xf32> to vector<1x16xf32>
    %21 = vector.broadcast %19 : vector<16x1xf32> to vector<16x16xf32>
    %22 = vector.broadcast %20 : vector<1x16xf32> to vector<16x16xf32>
    %23 = arith.addf %21, %22 : vector<16x16xf32>
    %cst_20 = arith.constant 0.000000e+00 : f32
    %24 = vector.broadcast %cst_20 : f32 to vector<16x16xf32>
    %25 = arith.cmpf ogt, %23, %24 : vector<16x16xf32>
    %cst_21 = arith.constant 2.000000e-01 : f32
    %26 = vector.broadcast %cst_21 : f32 to vector<16x16xf32>
    %27 = arith.mulf %26, %23 : vector<16x16xf32>
    %28 = arith.select %25, %23, %27 : vector<16x16xi1>, vector<16x16xf32>
    %cst_22 = arith.constant 0.000000e+00 : f32
    %29 = vector.broadcast %cst_22 : f32 to vector<16x16xf32>
    %30 = arith.cmpf ogt, %1, %29 : vector<16x16xf32>
    %cst_23 = arith.constant -1.000000e+30 : f32
    %31 = vector.broadcast %cst_23 : f32 to vector<16x16xf32>
    %32 = arith.select %30, %28, %31 : vector<16x16xi1>, vector<16x16xf32>
    %cst_24 = arith.constant dense<0xFF800000> : vector<16xf32>
    %33 = vector.multi_reduction <maximumf>, %32, %cst_24 [1] : vector<16x16xf32> to vector<16xf32>
    %34 = vector.shape_cast %33 : vector<16xf32> to vector<16x1xf32>
    %35 = vector.broadcast %34 : vector<16x1xf32> to vector<16x16xf32>
    %36 = arith.subf %32, %35 : vector<16x16xf32>
    %37 = math.exp %36 : vector<16x16xf32>
    %38 = arith.mulf %37, %1 : vector<16x16xf32>
    %cst_25 = arith.constant dense<0.000000e+00> : vector<16xf32>
    %39 = vector.multi_reduction <add>, %38, %cst_25 [1] : vector<16x16xf32> to vector<16xf32>
    %40 = vector.shape_cast %39 : vector<16xf32> to vector<16x1xf32>
    %cst_26 = arith.constant 0.000000e+00 : f32
    %41 = vector.broadcast %cst_26 : f32 to vector<16x1xf32>
    %42 = arith.cmpf ogt, %40, %41 : vector<16x1xf32>
    %cst_27 = arith.constant 1.000000e+00 : f32
    %43 = vector.broadcast %cst_27 : f32 to vector<16x1xf32>
    %44 = arith.select %42, %40, %43 : vector<16x1xi1>, vector<16x1xf32>
    %45 = tpu.reciprocal %44 {approx = true} : vector<16x1xf32> -> vector<16x1xf32>
    %46 = vector.broadcast %45 : vector<16x1xf32> to vector<16x16xf32>
    %47 = arith.mulf %38, %46 : vector<16x16xf32>
    %cst_28 = arith.constant dense<0.000000e+00> : vector<16x32xf32>
    %48 = tpu.matmul %47, %18, %cst_28 {dimension_numbers = #tpu.dot_dimension_numbers<[1], [0], [0], [1], [0, 0, 1, 1], [], []>} : vector<16x16xf32>, vector<16x32xf32>, vector<16x32xf32> -> vector<16x32xf32>
    %49 = vector.extract_strided_slice %17 {offsets = [0, 0], sizes = [32, 64], strides = [1, 1]} : vector<64x64xf32> to vector<32x64xf32>
    %cst_29 = arith.constant dense<0.000000e+00> : vector<16x64xf32>
    %50 = tpu.matmul %48, %49, %cst_29 {dimension_numbers = #tpu.dot_dimension_numbers<[1], [0], [0], [1], [0, 0, 1, 1], [], []>} : vector<16x32xf32>, vector<32x64xf32>, vector<16x64xf32> -> vector<16x64xf32>
    %51 = arith.addf %16, %50 : vector<16x64xf32>
    %52 = vector.extract_strided_slice %6 {offsets = [0, 32], sizes = [16, 32], strides = [1, 1]} : vector<16x64xf32> to vector<16x32xf32>
    %53 = vector.extract_strided_slice %8 {offsets = [0, 1], sizes = [16, 1], strides = [1, 1]} : vector<16x2xf32> to vector<16x1xf32>
    %54 = vector.extract_strided_slice %11 {offsets = [1, 0], sizes = [1, 16], strides = [1, 1]} : vector<2x16xf32> to vector<1x16xf32>
    %55 = vector.broadcast %53 : vector<16x1xf32> to vector<16x16xf32>
    %56 = vector.broadcast %54 : vector<1x16xf32> to vector<16x16xf32>
    %57 = arith.addf %55, %56 : vector<16x16xf32>
    %cst_30 = arith.constant 0.000000e+00 : f32
    %58 = vector.broadcast %cst_30 : f32 to vector<16x16xf32>
    %59 = arith.cmpf ogt, %57, %58 : vector<16x16xf32>
    %cst_31 = arith.constant 2.000000e-01 : f32
    %60 = vector.broadcast %cst_31 : f32 to vector<16x16xf32>
    %61 = arith.mulf %60, %57 : vector<16x16xf32>
    %62 = arith.select %59, %57, %61 : vector<16x16xi1>, vector<16x16xf32>
    %cst_32 = arith.constant 0.000000e+00 : f32
    %63 = vector.broadcast %cst_32 : f32 to vector<16x16xf32>
    %64 = arith.cmpf ogt, %1, %63 : vector<16x16xf32>
    %cst_33 = arith.constant -1.000000e+30 : f32
    %65 = vector.broadcast %cst_33 : f32 to vector<16x16xf32>
    %66 = arith.select %64, %62, %65 : vector<16x16xi1>, vector<16x16xf32>
    %cst_34 = arith.constant dense<0xFF800000> : vector<16xf32>
    %67 = vector.multi_reduction <maximumf>, %66, %cst_34 [1] : vector<16x16xf32> to vector<16xf32>
    %68 = vector.shape_cast %67 : vector<16xf32> to vector<16x1xf32>
    %69 = vector.broadcast %68 : vector<16x1xf32> to vector<16x16xf32>
    %70 = arith.subf %66, %69 : vector<16x16xf32>
    %71 = math.exp %70 : vector<16x16xf32>
    %72 = arith.mulf %71, %1 : vector<16x16xf32>
    %cst_35 = arith.constant dense<0.000000e+00> : vector<16xf32>
    %73 = vector.multi_reduction <add>, %72, %cst_35 [1] : vector<16x16xf32> to vector<16xf32>
    %74 = vector.shape_cast %73 : vector<16xf32> to vector<16x1xf32>
    %cst_36 = arith.constant 0.000000e+00 : f32
    %75 = vector.broadcast %cst_36 : f32 to vector<16x1xf32>
    %76 = arith.cmpf ogt, %74, %75 : vector<16x1xf32>
    %cst_37 = arith.constant 1.000000e+00 : f32
    %77 = vector.broadcast %cst_37 : f32 to vector<16x1xf32>
    %78 = arith.select %76, %74, %77 : vector<16x1xi1>, vector<16x1xf32>
    %79 = tpu.reciprocal %78 {approx = true} : vector<16x1xf32> -> vector<16x1xf32>
    %80 = vector.broadcast %79 : vector<16x1xf32> to vector<16x16xf32>
    %81 = arith.mulf %72, %80 : vector<16x16xf32>
    %cst_38 = arith.constant dense<0.000000e+00> : vector<16x32xf32>
    %82 = tpu.matmul %81, %52, %cst_38 {dimension_numbers = #tpu.dot_dimension_numbers<[1], [0], [0], [1], [0, 0, 1, 1], [], []>} : vector<16x16xf32>, vector<16x32xf32>, vector<16x32xf32> -> vector<16x32xf32>
    %83 = vector.extract_strided_slice %17 {offsets = [32, 0], sizes = [32, 64], strides = [1, 1]} : vector<64x64xf32> to vector<32x64xf32>
    %cst_39 = arith.constant dense<0.000000e+00> : vector<16x64xf32>
    %84 = tpu.matmul %82, %83, %cst_39 {dimension_numbers = #tpu.dot_dimension_numbers<[1], [0], [0], [1], [0, 0, 1, 1], [], []>} : vector<16x32xf32>, vector<32x64xf32>, vector<16x64xf32> -> vector<16x64xf32>
    %85 = arith.addf %51, %84 : vector<16x64xf32>
    %cst_40 = arith.constant 0.000000e+00 : f32
    %86 = vector.broadcast %cst_40 : f32 to vector<16x64xf32>
    %87 = arith.maximumf %85, %86 : vector<16x64xf32>
    %c0_41 = arith.constant 0 : index
    %c0_42 = arith.constant 0 : index
    %88 = vector.load %arg9[%c0_41, %c0_42] : memref<16x64xf32, #tpu.memory_space<vmem>>, vector<16x64xf32>
    tpu.vector_store %arg9[%c0_41, %c0_42], %87 {strides = array<i32>} : memref<16x64xf32, #tpu.memory_space<vmem>>, vector<16x64xf32>,
    return
  }
}

module attributes {stable_mosaic.version = 11 : i64} {
  func.func @post_mp_kernel(%arg0: memref<16x64xf32, #tpu.memory_space<vmem>>, %arg1: memref<64x32xf32, #tpu.memory_space<vmem>>, %arg2: memref<1x32xf32, #tpu.memory_space<vmem>>, %arg3: memref<32x8xf32, #tpu.memory_space<vmem>>, %arg4: memref<1x8xf32, #tpu.memory_space<vmem>>, %arg5: memref<16x8xf32, #tpu.memory_space<vmem>>) attributes {dimension_semantics = [], scalar_prefetch = 0 : i64, scratch_operands = 0 : i64, tpu.core_type = #tpu.core_type<tc>} {
    %c0 = arith.constant 0 : index
    %c0_0 = arith.constant 0 : index
    %0 = vector.load %arg0[%c0, %c0_0] : memref<16x64xf32, #tpu.memory_space<vmem>>, vector<16x64xf32>
    %c0_1 = arith.constant 0 : index
    %c0_2 = arith.constant 0 : index
    %1 = vector.load %arg1[%c0_1, %c0_2] : memref<64x32xf32, #tpu.memory_space<vmem>>, vector<64x32xf32>
    %cst = arith.constant dense<0.000000e+00> : vector<16x32xf32>
    %2 = tpu.matmul %0, %1, %cst {dimension_numbers = #tpu.dot_dimension_numbers<[1], [0], [0], [1], [0, 0, 1, 1], [], []>} : vector<16x64xf32>, vector<64x32xf32>, vector<16x32xf32> -> vector<16x32xf32>
    %c0_3 = arith.constant 0 : index
    %c0_4 = arith.constant 0 : index
    %3 = vector.load %arg2[%c0_3, %c0_4] : memref<1x32xf32, #tpu.memory_space<vmem>>, vector<1x32xf32>
    %4 = vector.broadcast %3 : vector<1x32xf32> to vector<16x32xf32>
    %5 = arith.addf %2, %4 : vector<16x32xf32>
    %c0_5 = arith.constant 0 : index
    %c0_6 = arith.constant 0 : index
    %6 = vector.load %arg3[%c0_5, %c0_6] : memref<32x8xf32, #tpu.memory_space<vmem>>, vector<32x8xf32>
    %cst_7 = arith.constant dense<0.000000e+00> : vector<16x8xf32>
    %7 = tpu.matmul %5, %6, %cst_7 {dimension_numbers = #tpu.dot_dimension_numbers<[1], [0], [0], [1], [0, 0, 1, 1], [], []>} : vector<16x32xf32>, vector<32x8xf32>, vector<16x8xf32> -> vector<16x8xf32>
    %c0_8 = arith.constant 0 : index
    %c0_9 = arith.constant 0 : index
    %8 = vector.load %arg4[%c0_8, %c0_9] : memref<1x8xf32, #tpu.memory_space<vmem>>, vector<1x8xf32>
    %9 = vector.broadcast %8 : vector<1x8xf32> to vector<16x8xf32>
    %10 = arith.addf %7, %9 : vector<16x8xf32>
    %cst_10 = arith.constant dense<0xFF800000> : vector<16xf32>
    %11 = vector.multi_reduction <maximumf>, %10, %cst_10 [1] : vector<16x8xf32> to vector<16xf32>
    %12 = vector.shape_cast %11 : vector<16xf32> to vector<16x1xf32>
    %13 = vector.broadcast %12 : vector<16x1xf32> to vector<16x8xf32>
    %14 = arith.subf %10, %13 : vector<16x8xf32>
    %15 = math.exp %14 : vector<16x8xf32>
    %cst_11 = arith.constant dense<0.000000e+00> : vector<16xf32>
    %16 = vector.multi_reduction <add>, %15, %cst_11 [1] : vector<16x8xf32> to vector<16xf32>
    %17 = vector.shape_cast %16 : vector<16xf32> to vector<16x1xf32>
    %18 = math.log %17 : vector<16x1xf32>
    %19 = vector.broadcast %18 : vector<16x1xf32> to vector<16x8xf32>
    %20 = arith.subf %14, %19 : vector<16x8xf32>
    %c0_12 = arith.constant 0 : index
    %c0_13 = arith.constant 0 : index
    %21 = vector.load %arg5[%c0_12, %c0_13] : memref<16x8xf32, #tpu.memory_space<vmem>>, vector<16x8xf32>
    tpu.vector_store %arg5[%c0_12, %c0_13], %20 {strides = array<i32>} : memref<16x8xf32, #tpu.memory_space<vmem>>, vector<16x8xf32>,
    return
  }
}

</mosaic_0001>

<bundles_post_ra>
// kernel: gnn_stack_forward.5
= control target key start
LH: loop header
LB: loop body
LE: loop exit
PB: predicated region body
PF: predicated region fallthrough
CT: control target
= control target key end

     0   :  { %vm37_vm0 = vcmask 523264   ;;  %vm130_vm1 = vcmask 261120   ;;  %vm212_vm2 = vcmask 64512   ;;  %s395_s1 = inlined_call_operand.vmem [shape: f32[64,32], index: 1, kind: input, shape index: {}]   ;;  %s396_s0 = inlined_call_operand.vmem [shape: f32[16,64], index: 0, kind: input, shape index: {}]   ;;  %s397_s3 = inlined_call_operand.vmem [shape: f32[32,8], index: 3, kind: input, shape index: {}]   ;;  %s398_s2 = inlined_call_operand.vmem [shape: f32[1,32], index: 2, kind: input, shape index: {}]   ;;  %s399_s4 = inlined_call_operand.vmem [shape: f32[1,8], index: 4, kind: input, shape index: {}]   ;;  %s400_s5 = inlined_call_operand.vmem [shape: f32[16,8], index: 5, kind: output, shape index: {}]  }
   0x1   :  { %v29_v0 = vld [vmem:[%s395_s1 + $0x38] sm:$0xff]  ;;  %v28_v1 = vld [vmem:[%s395_s1 + $0x30] sm:$0xff]  ;;  %v27_v2 = vld [vmem:[%s395_s1 + $0x28] sm:$0xff] }
   0x2   :  { %265 = vmatprep.subr.mxu0 %v29_v0  ;;  %v20_v3 = vld [vmem:[%s396_s0] sm:$0xff]  ;;  %v122_v4 = vld [vmem:[%s397_s3 + $0x18] sm:$0xff]  ;;  %v24_v7 = vld [vmem:[%s395_s1 + $0x10] sm:$0xff] }
   0x3   :  { %266 = vmatpush3.msra.mxu0 %v29_v0  ;;  %281 = vmatprep.mubr.msk.f32.mxu0 %vm37_vm0, %v20_v3  ;;  %v26_v5 = vld [vmem:[%s395_s1 + $0x20] sm:$0xff]  ;;  %v25_v6 = vld [vmem:[%s395_s1 + $0x18] sm:$0xff]  ;;  %v23_v8 = vld [vmem:[%s395_s1 + $0x8] sm:$0xff] }
   0x4   :  { %267 = vmatprep.subr.mxu0 %v28_v1  ;;  %284 = vmatprep.subr.mxu1 %v122_v4  ;;  %v22_v9 = vld [vmem:[%s395_s1] sm:$0xff]  ;;  %v21_v10 = vld [vmem:[%s396_s0 + $0x8] sm:$0xff]  ;;  %v121_v11 = vld [vmem:[%s397_s3 + $0x10] sm:$0xff] }
   0x5   :  { %268 = vmatpush3.msra.mxu0 %v28_v1  ;;  %285 = vmatpush3.msra.mxu1 %v122_v4  ;;  %v120_v12 = vld [vmem:[%s397_s3 + $0x8] sm:$0xff]  ;;  %v119_v13 = vld [vmem:[%s397_s3] sm:$0xff] }
   0x6   :  { %269 = vmatprep.subr.mxu0 %v27_v2  ;;  %286 = vmatprep.subr.mxu1 %v121_v11  ;;  %v243_v15 = vld [vmem:[%s398_s2] ss:$0 sm:$0xff] }
   0x7   :  { %270 = vmatpush3.msra.mxu0 %v27_v2  ;;  %287 = vmatpush3.msra.mxu1 %v121_v11  ;;  %v246_v20 = vld [vmem:[%s399_s4] ss:$0 sm:$0xff] }
   0x8   :  { %271 = vmatprep.subr.mxu0 %v26_v5  ;;  %288 = vmatprep.subr.mxu1 %v120_v12 }
   0x9   :  { %272 = vmatpush3.msra.mxu0 %v26_v5  ;;  %289 = vmatpush3.msra.mxu1 %v120_v12 }
   0xa   :  { %273 = vmatprep.subr.mxu0 %v25_v6  ;;  %290 = vmatprep.subr.mxu1 %v119_v13 }
   0xb   :  { %274 = vmatpush3.msra.mxu0 %v25_v6  ;;  %291 = vmatpush3.msra.mxu1 %v119_v13 }
   0xc   :  { %275 = vmatprep.subr.mxu0 %v24_v7 }
   0xd   :  { %276 = vmatpush3.msra.mxu0 %v24_v7 }
   0xe   :  { %277 = vmatprep.subr.mxu0 %v23_v8 }
   0xf   :  { %278 = vmatpush3.msra.mxu0 %v23_v8 }
  0x10   :  { %279 = vmatprep.subr.mxu0 %v22_v9 }
  0x11   :  { %280 = vmatpush3.msra.mxu0 %v22_v9 }
  0x12   :  { %282 = vmatmul.mubr.msk.f32.vlgmr.msra.gmra.mxu0 %vm37_vm0, %v21_v10 }
  0xd2   :  { %v283_v14 = vpop.f32.mrf.mxu0 }
  0xd3   :  { %v116_v18 = vadd.f32 %v283_v14, %v243_v15 }
  0xd4   :  { %v110_v16 = vpop.f32.mrf.mxu0 }
  0xd5   :  { %v111_v17 = vadd.f32 %v243_v15, %v110_v16 }
  0xd7   :  { %292 = vmatprep.mubr.msk.f32.mxu1 %vm130_vm1, %v111_v17 }
  0xd8   :  { %293 = vmatmul.mubr.msk.f32.vlgmr.msra.gmra.mxu1 %vm130_vm1, %v116_v18 }
 0x198   :  { %v294_v19 = vpop.f32.mrf.mxu1 }
 0x199   :  { %v209_v23 = vadd.f32 %v294_v19, %v246_v20 }
 0x19a   :  { %v203_v21 = vpop.f32.mrf.mxu1 }
 0x19b   :  { %v204_v22 = vadd.f32 %v246_v20, %v203_v21  ;;  %v216_v25 = vsel %vm212_vm2, %v209_v23, -inf }
 0x19d   :  { %v213_v24 = vsel %vm212_vm2, %v204_v22, -inf }
 0x19e   :  { %214 = vmax.xlane.f32.xlu0 %v213_v24 }
 0x1a2   :  { %217 = vmax.xlane.f32.xlu0 %v216_v25 }
 0x227   :  { %v215_v26 = vpop.xlane.xlu0 %214 }
 0x228   :  { %v219_v27 = vsub.f32 %v204_v22, %v215_v26 }
 0x22a   :  { %v221_v28 = vmul.f32 1.442695, %v219_v27 }
 0x22b   :  { %v218_v29 = vpop.xlane.xlu0 %217 }
 0x22c   :  { %295 = vpow2.f32 %v221_v28  ;;  %v220_v30 = vsub.f32 %v209_v23, %v218_v29 }
 0x22e   :  { %v223_v31 = vmul.f32 1.442695, %v220_v30 }
 0x230   :  { %297 = vpow2.f32 %v223_v31 }
 0x239   :  { %v296_v32 = vpop.eup %295 }
 0x23a   :  { %v225_v33 = vsel %vm212_vm2, %v296_v32, 0.0 }
 0x23b   :  { %226 = vadd.xlane.f32.xlu1 %v225_v33 }
 0x23d   :  { %v298_v34 = vpop.eup %297 }
 0x23e   :  { %v228_v35 = vsel %vm212_vm2, %v298_v34, 0.0 }
 0x23f   :  { %229 = vadd.xlane.f32.xlu1 %v228_v35 }
 0x2c4   :  { %v227_v36 = vpop.xlane.xlu1 %226 }
 0x2c5   :  { %299 = vlog2.f32 %v227_v36 }
 0x2c8   :  { %v230_v37 = vpop.xlane.xlu1 %229 }
 0x2c9   :  { %301 = vlog2.f32 %v230_v37 }
 0x2d2   :  { %v300_v38 = vpop.eup %299 }
 0x2d3   :  { %v232_v39 = vmul.f32 0.6931472, %v300_v38 }
 0x2d5   :  { %v235_v40 = vsub.f32 %v219_v27, %v232_v39 }
 0x2d6   :  { %v302_v41 = vpop.eup %301 }
 0x2d7   :  { %237 = vst.msk [vmem:[%s400_s5] sm:$0xff] %vm212_vm2, %v235_v40  ;;  %v234_v42 = vmul.f32 0.6931472, %v302_v41 }
 0x2d9   :  { %v236_v43 = vsub.f32 %v220_v30, %v234_v42 }
 0x2db   :  { %238 = vst.msk [vmem:[%s400_s5 + $0x8] sm:$0xff] %vm212_vm2, %v236_v43 }

// kernel: gnn_stack_forward.3
= control target key start
LH: loop header
LB: loop body
LE: loop exit
PB: predicated region body
PF: predicated region fallthrough
CT: control target
= control target key end

     0   :  { %vm45_vm0 = vcmask 130048   ;;  %v1048_v20 = vmov 0   ;;  %vm135_vm1 = vcmask 523264   ;;  %v1049_v26 = vmov 1   ;;  %s1266_s2 = inlined_call_operand.vmem [shape: f32[16,64], index: 2, kind: input, shape index: {}]   ;;  %s1267_s0 = inlined_call_operand.vmem [shape: f32[16,16], index: 0, kind: input, shape index: {}]   ;;  %s1268_s4 = inlined_call_operand.vmem [shape: f32[64,2], index: 4, kind: input, shape index: {}]   ;;  %s1269_s5 = inlined_call_operand.vmem [shape: f32[64,2], index: 5, kind: input, shape index: {}]   ;;  %s1270_s3 = inlined_call_operand.vmem [shape: f32[1,64], index: 3, kind: input, shape index: {}]   ;;  %s1271_s1 = inlined_call_operand.vmem [shape: f32[16,16], index: 1, kind: input, shape index: {}]   ;;  %s1272_s6 = inlined_call_operand.vmem [shape: f32[16,64], index: 6, kind: input, shape index: {}]   ;;  %s1273_s7 = inlined_call_operand.vmem [shape: f32[64,64], index: 7, kind: input, shape index: {}]   ;;  %s1274_s8 = inlined_call_operand.vmem [shape: f32[1,64], index: 8, kind: input, shape index: {}]   ;;  %s1275_s9 = inlined_call_operand.vmem [shape: f32[16,64], index: 9, kind: output, shape index: {}]  }
   0x1   :  { %v37_v0 = vld [vmem:[%s1266_s2 + $0x8] sm:$0xff]  ;;  %v36_v1 = vld [vmem:[%s1266_s2] sm:$0xff]  ;;  %v224_v3 = vld [vmem:[%s1268_s4 + $0x38] sm:$0xff]  ;;  %1029 = vset.pattern.permute.xlu0 %v1048_v20  ;;  %1030 = vset.pattern.permute.xlu1 %v1049_v26  ;;  %v434_v31 = vlaneseq  ;;  %vm559_vm12 = vcmask 261120  }
   0x2   :  { %v1110_v2 = vld [vmem:[%s1267_s0] sm:$0xff]  ;;  %937 = vmatprep.subr.mxu1 %v37_v0  ;;  %v223_v4 = vld [vmem:[%s1268_s4 + $0x30] sm:$0xff]  ;;  %v1123_v5 = vld [vmem:[%s1267_s0 + $0x8] sm:$0xff]  ;;  %963 = vmatprep.subr.mxu0 %v224_v3 }
   0x3   :  { %941 = vmatprep.mubr.msk.f32.mxu1 %vm45_vm0, %v1110_v2  ;;  %938 = vmatpush3.msra.mxu1 %v37_v0  ;;  %v134_v6 = vld [vmem:[%s1269_s5 + $0x38] sm:$0xff]  ;;  %v222_v7 = vld [vmem:[%s1268_s4 + $0x28] sm:$0xff]  ;;  %v133_v8 = vld [vmem:[%s1269_s5 + $0x30] sm:$0xff]  ;;  %v435_v33 = vshrl.u32 %v434_v31, 7 }
   0x4   :  { %939 = vmatprep.subr.mxu1 %v36_v1  ;;  %964 = vmatpush3.msra.mxu0 %v224_v3  ;;  %v221_v9 = vld [vmem:[%s1268_s4 + $0x20] sm:$0xff]  ;;  %v132_v10 = vld [vmem:[%s1269_s5 + $0x28] sm:$0xff]  ;;  %v220_v11 = vld [vmem:[%s1268_s4 + $0x18] sm:$0xff] }
   0x5   :  { %940 = vmatpush3.msra.mxu1 %v36_v1  ;;  %965 = vmatprep.subr.mxu0 %v223_v4  ;;  %v131_v12 = vld [vmem:[%s1269_s5 + $0x20] sm:$0xff]  ;;  %v219_v13 = vld [vmem:[%s1268_s4 + $0x10] sm:$0xff]  ;;  %v130_v14 = vld [vmem:[%s1269_s5 + $0x18] sm:$0xff]  ;;  %v436_v36 = vsub.s32 0, %v435_v33  ;;  %v653_v37 = vsub.s32 1, %v435_v33 }
   0x6   :  { %942 = vmatmul.mubr.msk.f32.vlgmr.msra.gmra.mxu1 %vm45_vm0, %v1123_v5  ;;  %944 = vmatprep.subr.mxu1 %v134_v6  ;;  %v218_v15 = vld [vmem:[%s1268_s4 + $0x8] sm:$0xff]  ;;  %v129_v16 = vld [vmem:[%s1269_s5 + $0x10] sm:$0xff]  ;;  %v217_v17 = vld [vmem:[%s1268_s4] sm:$0xff] }
   0x7   :  { %966 = vmatpush3.msra.mxu0 %v223_v4  ;;  %945 = vmatpush3.msra.mxu1 %v134_v6  ;;  %v128_v18 = vld [vmem:[%s1269_s5 + $0x8] sm:$0xff]  ;;  %v127_v19 = vld [vmem:[%s1269_s5] sm:$0xff] }
   0x8   :  { %967 = vmatprep.subr.mxu0 %v222_v7  ;;  %946 = vmatprep.subr.mxu1 %v133_v8  ;;  %v871_v21 = vld [vmem:[%s1270_s3] ss:$0 sm:$0xff]  ;;  %v35_v41 = vld [vmem:[%s1271_s1 + $0x8] sm:$0xff] }
   0x9   :  { %968 = vmatpush3.msra.mxu0 %v222_v7  ;;  %947 = vmatpush3.msra.mxu1 %v133_v8  ;;  %v1196_v42 = vld [vmem:[%s1271_s1] sm:$0xff]  ;;  %vm447_vm2 = vcmp.gt.f32.partialorder %v35_v41, 0.0  ;;  %s1050_s1 = smov 96  }
   0xa   :  { %969 = vmatprep.subr.mxu0 %v221_v9  ;;  %948 = vmatprep.subr.mxu1 %v132_v10  ;;  %vm446_vm3 = vcmp.gt.f32.partialorder %v1196_v42, 0.0 }
   0xb   :  { %970 = vmatpush3.msra.mxu0 %v221_v9  ;;  %949 = vmatpush3.msra.mxu1 %v132_v10 }
   0xc   :  { %971 = vmatprep.subr.mxu0 %v220_v11  ;;  %950 = vmatprep.subr.mxu1 %v131_v12 }
   0xd   :  { %972 = vmatpush3.msra.mxu0 %v220_v11  ;;  %951 = vmatpush3.msra.mxu1 %v131_v12 }
   0xe   :  { %973 = vmatprep.subr.mxu0 %v219_v13  ;;  %952 = vmatprep.subr.mxu1 %v130_v14 }
   0xf   :  { %974 = vmatpush3.msra.mxu0 %v219_v13  ;;  %953 = vmatpush3.msra.mxu1 %v130_v14 }
  0x10   :  { %975 = vmatprep.subr.mxu0 %v218_v15  ;;  %954 = vmatprep.subr.mxu1 %v129_v16 }
  0x11   :  { %976 = vmatpush3.msra.mxu0 %v218_v15  ;;  %955 = vmatpush3.msra.mxu1 %v129_v16 }
  0x12   :  { %977 = vmatprep.subr.mxu0 %v217_v17  ;;  %956 = vmatprep.subr.mxu1 %v128_v18 }
  0x13   :  { %978 = vmatpush3.msra.mxu0 %v217_v17  ;;  %957 = vmatpush3.msra.mxu1 %v128_v18 }
  0x14   :  { %958 = vmatprep.subr.mxu1 %v127_v19 }
  0x15   :  { %959 = vmatpush3.msra.mxu1 %v127_v19 }
  0xc6   :  { %v943_v22 = vpop.f32.mrf.mxu1 }
  0xc7   :  { %v1172_v23 = vadd.f32 %v943_v22, %v871_v21 }
  0xc8   :  { %v118_v24 = vpop.f32.mrf.mxu1 }
  0xc9   :  { %v1174_v25 = vadd.f32 %v871_v21, %v118_v24  ;;  %989 = vmatprep.subr.mxu0 %v1172_v23 }
  0xcb   :  { %960 = vmatprep.mubr.msk.f32.mxu1 %vm135_vm1, %v1174_v25  ;;  %979 = vmatprep.mubr.msk.f32.mxu0 %vm135_vm1, %v1174_v25 }
  0xcc   :  { %961 = vmatmul.mubr.msk.f32.vlgmr.msra.gmra.mxu1 %vm135_vm1, %v1172_v23  ;;  %980 = vmatmul.mubr.msk.f32.vlgmr.msra.gmra.mxu0 %vm135_vm1, %v1172_v23 }
  0xcd   :  { %990 = vmatpush3.msra.mxu0 %v1172_v23  ;;  %986 = vmatprep.mubr.msk.f32.mxu1 %vm45_vm0, %v1110_v2 }
  0xce   :  { %991 = vmatprep.subr.mxu0 %v1174_v25 }
  0xcf   :  { %992 = vmatpush3.msra.mxu0 %v1174_v25 }
 0x18c   :  { %v962_v27 = vpop.f32.mrf.mxu1  ;;  %v981_v29 = vpop.f32.mrf.mxu0 }
 0x18d   :  { %431 = vperm.xlu0 %1029, %v962_v27  }
 0x18e   :  { %v208_v28 = vpop.f32.mrf.mxu1  ;;  %v291_v30 = vpop.f32.mrf.mxu0 }
 0x18f   :  { %644 = vperm.xlu1 %1030, %v208_v28  }
 0x191   :  { %426 = vperm.xlu0 %1029, %v208_v28   ;;  %v332_v28 = vld [vmem:[%s1272_s6] sm:$0xff] }
 0x193   :  { %648 = vperm.xlu1 %1030, %v962_v27   ;;  %v333_v27 = vld [vmem:[%s1272_s6 + $0x8] sm:$0xff] }
 0x194   :  { %982 = vmatprep.subr.mxu1 %v333_v27 }
 0x195   :  { %983 = vmatpush3.msra.mxu1 %v333_v27 }
 0x196   :  { %984 = vmatprep.subr.mxu1 %v332_v28 }
 0x197   :  { %985 = vmatpush3.msra.mxu1 %v332_v28 }
 0x198   :  { %987 = vmatmul.mubr.msk.f32.vlgmr.msra.gmra.mxu1 %vm45_vm0, %v1123_v5 }
 0x1af   :  { %300 = vxpose.xlu0.b32.start [1/2] (short) (narrow) %v291_v30, 8 }
 0x1b3   :  { %301 = vxpose.xlu0.b32.end [2/2] (short) (narrow) %v981_v29, 8  ;;  %v419_v29 = vld [vmem:[%s1273_s7 + $0x18] sm:$0xff] }
 0x1b4   :  { %996 = vmatprep.subr.mxu1 %v419_v29 }
 0x1b5   :  { %997 = vmatpush3.msra.mxu1 %v419_v29 }
 0x1dc   :  { %1031 = vset.pattern.permute.xlu0 %v1049_v26 }
 0x208   :  { %v432_v32 = vpop.permute.xlu0 %431 }
 0x20a   :  { %v645_v34 = vpop.permute.xlu1 %644 }
 0x20c   :  { %v427_v35 = vpop.permute.xlu0 %426 }
 0x20e   :  { %v649_v43 = vpop.permute.xlu1 %648 }
 0x22b   :  { %v316_v38 = vpop.trf.xlu0 }
 0x22c   :  { %v437_v39 = vrot.slane %v316_v38, %v436_v36  ;;  %v654_v40 = vrot.slane %v316_v38, %v653_v37 }
 0x22e   :  { %v438_v44 = vadd.f32 %v437_v39, %v427_v35  ;;  %v439_v45 = vadd.f32 %v437_v39, %v432_v32  ;;  %v655_v46 = vadd.f32 %v654_v40, %v645_v34  ;;  %v656_v47 = vadd.f32 %v654_v40, %v649_v43 }
 0x230   :  { %vm441_vm4 = vcmp.gt.f32.partialorder %v439_v45, 0.0  ;;  %v443_v48 = vmul.f32 0.2, %v439_v45  ;;  %vm440_vm5 = vcmp.gt.f32.partialorder %v438_v44, 0.0  ;;  %v442_v49 = vmul.f32 0.2, %v438_v44 }
 0x231   :  { %vm657_vm6 = vcmp.gt.f32.partialorder %v655_v46, 0.0  ;;  %v659_v50 = vmul.f32 0.2, %v655_v46  ;;  %v660_v53 = vmul.f32 0.2, %v656_v47  ;;  %vm658_vm7 = vcmp.gt.f32.partialorder %v656_v47, 0.0 }
 0x232   :  { %v445_v51 = vsel %vm441_vm4, %v439_v45, %v443_v48  ;;  %v444_v52 = vsel %vm440_vm5, %v438_v44, %v442_v49  ;;  %v416_v48 = vld [vmem:[%s1273_s7] sm:$0xff]  ;;  %v422_v49 = vld [vmem:[%s1273_s7 + $0x30] sm:$0xff] }
 0x233   :  { %v449_v54 = vsel %vm447_vm2, %v445_v51, -1e+30  ;;  %v448_v55 = vsel %vm446_vm3, %v444_v52, -1e+30  ;;  %v661_v56 = vsel %vm657_vm6, %v655_v46, %v659_v50  ;;  %v662_v60 = vsel %vm658_vm7, %v656_v47, %v660_v53  ;;  %v417_v46 = vld [vmem:[%s1273_s7 + $0x8] sm:$0xff]  ;;  %v423_v47 = vld [vmem:[%s1273_s7 + $0x38] sm:$0xff] }
 0x234   :  { %v453_v57 = vsel %vm45_vm0, %v449_v54, -inf  ;;  %v450_v58 = vsel %vm45_vm0, %v448_v55, -inf  ;;  %v663_v59 = vsel %vm446_vm3, %v661_v56, -1e+30  ;;  %v664_v62 = vsel %vm447_vm2, %v662_v60, -1e+30 }
 0x235   :  { %454 = vmax.xlane.f32.xlu0 %v453_v57  ;;  %451 = vmax.xlane.f32.xlu1 %v450_v58  ;;  %v665_v61 = vsel %vm45_vm0, %v663_v59, -inf  ;;  %v668_v63 = vsel %vm45_vm0, %v664_v62, -inf  ;;  %v421_v50 = vld [vmem:[%s1273_s7 + $0x28] sm:$0xff]  ;;  %v420_v51 = vld [vmem:[%s1273_s7 + $0x20] sm:$0xff] }
 0x236   :  { %v878_v57 = vld [vmem:[%s1274_s8] ss:$0 sm:$0xff] }
 0x239   :  { %666 = vmax.xlane.f32.xlu1 %v665_v61 }
 0x23d   :  { %669 = vmax.xlane.f32.xlu1 %v668_v63 }
 0x24e   :  { %695 = vrot.lane.b32.xlu1 %v1172_v23, %s1050_s1 }
 0x258   :  { %v988_v56 = vpop.f32.mrf.mxu1 }
 0x259   :  { %v413_v60 = vadd.f32 %v988_v56, %v878_v57 }
 0x25a   :  { %v407_v58 = vpop.f32.mrf.mxu1 }
 0x2be   :  { %v455_v0 = vpop.xlane.xlu0 %454  ;;  %v452_v1 = vpop.xlane.xlu1 %451 }
 0x2bf   :  { %v457_v2 = vsub.f32 %v449_v54, %v455_v0  ;;  %v456_v4 = vsub.f32 %v448_v55, %v452_v1 }
 0x2c1   :  { %v460_v3 = vmul.f32 1.442695, %v457_v2  ;;  %v458_v7 = vmul.f32 1.442695, %v456_v4 }
 0x2c2   :  { %v667_v6 = vpop.xlane.xlu1 %666 }
 0x2c3   :  { %1032 = vpow2.f32 %v460_v3  ;;  %v671_v9 = vsub.f32 %v663_v59, %v667_v6 }
 0x2c4   :  { %1034 = vpow2.f32 %v458_v7 }
 0x2c5   :  { %v673_v13 = vmul.f32 1.442695, %v671_v9 }
 0x2c6   :  { %v670_v8 = vpop.xlane.xlu1 %669 }
 0x2c7   :  { %v672_v10 = vsub.f32 %v664_v62, %v670_v8  ;;  %v408_v62 = vadd.f32 %v878_v57, %v407_v58 }
 0x2c9   :  { %v675_v11 = vmul.f32 1.442695, %v672_v10 }
 0x2ca   :  { %v696_v12 = vpop.permute.xlu1 %695 }
 0x2cb   :  { %1036 = vpow2.f32 %v675_v11  ;;  %1007 = vmatprep.subr.mxu0 %v696_v12 }
 0x2cc   :  { %1038 = vpow2.f32 %v673_v13 }
 0x2d0   :  { %v1033_v14 = vpop.eup %1032 }
 0x2d1   :  { %v463_v15 = vmul.f32 %v1033_v14, %v35_v41  ;;  %v1035_v17 = vpop.eup %1034 }
 0x2d2   :  { %v462_v21 = vmul.f32 %v1035_v17, %v1196_v42 }
 0x2d3   :  { %v467_v16 = vsel %vm45_vm0, %v463_v15, 0.0 }
 0x2d4   :  { %468 = vadd.xlane.f32.xlu1 %v467_v16  ;;  %v464_v23 = vsel %vm45_vm0, %v462_v21, 0.0 }
 0x2d8   :  { %v1037_v18 = vpop.eup %1036 }
 0x2d9   :  { %v678_v19 = vmul.f32 %v1037_v18, %v35_v41  ;;  %v1039_v22 = vpop.eup %1038 }
 0x2da   :  { %v677_v24 = vmul.f32 %v1039_v22, %v1196_v42 }
 0x2db   :  { %v682_v20 = vsel %vm45_vm0, %v678_v19, 0.0 }
 0x2dc   :  { %683 = vadd.xlane.f32.xlu1 %v682_v20  ;;  %v679_v26 = vsel %vm45_vm0, %v677_v24, 0.0 }
 0x2e0   :  { %465 = vadd.xlane.f32.xlu1 %v464_v23 }
 0x2e4   :  { %680 = vadd.xlane.f32.xlu1 %v679_v26 }
 0x2f5   :  { %693 = vrot.lane.b32.xlu1 %v1174_v25, %s1050_s1  ;;  %v418_v25 = vld [vmem:[%s1273_s7 + $0x10] sm:$0xff] }
 0x2f6   :  { %998 = vmatprep.subr.mxu1 %v418_v25 }
 0x2f7   :  { %999 = vmatpush3.msra.mxu1 %v418_v25 }
 0x2f8   :  { %1000 = vmatprep.subr.mxu1 %v417_v46 }
 0x2f9   :  { %1001 = vmatpush3.msra.mxu1 %v417_v46 }
 0x2fa   :  { %1002 = vmatprep.subr.mxu1 %v416_v48 }
 0x2fb   :  { %1003 = vmatpush3.msra.mxu1 %v416_v48 }
 0x35d   :  { %v469_v30 = vpop.xlane.xlu1 %468 }
 0x35e   :  { %vm471_vm8 = vcmp.gt.f32.partialorder %v469_v30, 0.0 }
 0x35f   :  { %v473_v32 = vsel %vm471_vm8, %v469_v30, 1.0 }
 0x360   :  { %1040 = vrcp.f32 %v473_v32 }
 0x365   :  { %v684_v31 = vpop.xlane.xlu1 %683 }
 0x366   :  { %vm686_vm9 = vcmp.gt.f32.partialorder %v684_v31, 0.0 }
 0x367   :  { %v688_v35 = vsel %vm686_vm9, %v684_v31, 1.0 }
 0x369   :  { %v466_v33 = vpop.xlane.xlu1 %465 }
 0x36a   :  { %vm470_vm10 = vcmp.gt.f32.partialorder %v466_v33, 0.0 }
 0x36b   :  { %v472_v34 = vsel %vm470_vm10, %v466_v33, 1.0 }
 0x36c   :  { %1042 = vrcp.f32 %v472_v34 }
 0x36d   :  { %v681_v36 = vpop.xlane.xlu1 %680  ;;  %1044 = vrcp.f32 %v688_v35  ;;  %v1041_v5 = vpop.eup %1040 }
 0x36e   :  { %vm685_vm11 = vcmp.gt.f32.partialorder %v681_v36, 0.0  ;;  %v477_v40 = vmul.f32 %v1041_v5, %v463_v15 }
 0x36f   :  { %v687_v37 = vsel %vm685_vm11, %v681_v36, 1.0 }
 0x370   :  { %1046 = vrcp.f32 %v687_v37 }
 0x371   :  { %v694_v43 = vpop.permute.xlu1 %693 }
 0x379   :  { %v1043_v38 = vpop.eup %1042 }
 0x37a   :  { %v476_v39 = vmul.f32 %v1043_v38, %v462_v21  ;;  %v1045_v41 = vpop.eup %1044 }
 0x37b   :  { %v692_v45 = vmul.f32 %v1045_v41, %v678_v19 }
 0x37c   :  { %993 = vmatprep.mubr.msk.f32.mxu0 %vm45_vm0, %v476_v39 }
 0x37d   :  { %v1047_v42 = vpop.eup %1046  ;;  %994 = vmatmul.mubr.msk.f32.vlgmr.msra.gmra.mxu0 %vm45_vm0, %v477_v40 }
 0x37e   :  { %1008 = vmatpush3.msra.mxu0 %v696_v12  ;;  %v691_v44 = vmul.f32 %v1047_v42, %v677_v24 }
 0x37f   :  { %1009 = vmatprep.subr.mxu0 %v694_v43 }
 0x380   :  { %1010 = vmatpush3.msra.mxu0 %v694_v43  ;;  %1011 = vmatprep.mubr.msk.f32.mxu0 %vm45_vm0, %v691_v44 }
 0x381   :  { %1012 = vmatmul.mubr.msk.f32.vlgmr.msra.gmra.mxu0 %vm45_vm0, %v692_v45  ;;  %1014 = vmatprep.subr.mxu0 %v423_v47 }
 0x382   :  { %1015 = vmatpush3.msra.mxu0 %v423_v47 }
 0x383   :  { %1016 = vmatprep.subr.mxu0 %v422_v49 }
 0x384   :  { %1017 = vmatpush3.msra.mxu0 %v422_v49 }
 0x385   :  { %1018 = vmatprep.subr.mxu0 %v421_v50 }
 0x386   :  { %1019 = vmatpush3.msra.mxu0 %v421_v50 }
 0x387   :  { %1020 = vmatprep.subr.mxu0 %v420_v51 }
 0x388   :  { %1021 = vmatpush3.msra.mxu0 %v420_v51 }
 0x43d   :  { %v995_v52 = vpop.f32.mrf.mxu0 }
 0x43f   :  { %v550_v53 = vpop.f32.mrf.mxu0 }
 0x440   :  { %1004 = vmatprep.mubr.msk.f32.mxu1 %vm559_vm12, %v550_v53 }
 0x441   :  { %1005 = vmatmul.mubr.msk.f32.vlgmr.msra.gmra.mxu1 %vm559_vm12, %v995_v52  ;;  %v1013_v54 = vpop.f32.mrf.mxu0 }
 0x443   :  { %v771_v55 = vpop.f32.mrf.mxu0 }
 0x444   :  { %1022 = vmatprep.mubr.msk.f32.mxu0 %vm559_vm12, %v771_v55 }
 0x445   :  { %1023 = vmatmul.mubr.msk.f32.vlgmr.msra.gmra.mxu0 %vm559_vm12, %v1013_v54 }
 0x501   :  { %v1006_v59 = vpop.f32.mrf.mxu1 }
 0x502   :  { %v642_v63 = vadd.f32 %v1006_v59, %v413_v60 }
 0x503   :  { %v632_v61 = vpop.f32.mrf.mxu1 }
 0x504   :  { %v641_v1 = vadd.f32 %v632_v61, %v408_v62 }
 0x505   :  { %v1024_v0 = vpop.f32.mrf.mxu0 }
 0x506   :  { %v862_v2 = vadd.f32 %v1024_v0, %v642_v63 }
 0x507   :  { %v852_v3 = vpop.f32.mrf.mxu0 }
 0x508   :  { %v864_v4 = vmax.f32 %v862_v2, 0.0  ;;  %v861_v6 = vadd.f32 %v852_v3, %v641_v1 }
 0x50a   :  { %866 = vst.msk [vmem:[%s1275_s9 + $0x8] sm:$0xff] %vm135_vm1, %v864_v4  ;;  %v863_v7 = vmax.f32 %v861_v6, 0.0 }
 0x50c   :  { %865 = vst.msk [vmem:[%s1275_s9] sm:$0xff] %vm135_vm1, %v863_v7 }

// kernel: gnn_stack_forward.4
= control target key start
LH: loop header
LB: loop body
LE: loop exit
PB: predicated region body
PF: predicated region fallthrough
CT: control target
= control target key end

     0   :  { %vm51_vm0 = vcmask 523264   ;;  %v1096_v27 = vmov 0   ;;  %v1097_v40 = vmov 1   ;;  %v445_v45 = vlaneseq  ;;  %s1350_s2 = inlined_call_operand.vmem [shape: f32[64,64], index: 2, kind: input, shape index: {}]   ;;  %s1351_s0 = inlined_call_operand.vmem [shape: f32[16,64], index: 0, kind: input, shape index: {}]   ;;  %s1352_s5 = inlined_call_operand.vmem [shape: f32[64,2], index: 5, kind: input, shape index: {}]   ;;  %s1353_s4 = inlined_call_operand.vmem [shape: f32[64,2], index: 4, kind: input, shape index: {}]   ;;  %s1354_s6 = inlined_call_operand.vmem [shape: f32[64,64], index: 6, kind: input, shape index: {}]   ;;  %s1355_s3 = inlined_call_operand.vmem [shape: f32[1,64], index: 3, kind: input, shape index: {}]   ;;  %s1356_s1 = inlined_call_operand.vmem [shape: f32[16,16], index: 1, kind: input, shape index: {}]   ;;  %s1357_s7 = inlined_call_operand.vmem [shape: f32[64,64], index: 7, kind: input, shape index: {}]   ;;  %s1358_s8 = inlined_call_operand.vmem [shape: f32[1,64], index: 8, kind: input, shape index: {}]   ;;  %s1359_s9 = inlined_call_operand.vmem [shape: f32[16,64], index: 9, kind: output, shape index: {}]  }
   0x1   :  { %v43_v0 = vld [vmem:[%s1350_s2 + $0x38] sm:$0xff]  ;;  %v42_v1 = vld [vmem:[%s1350_s2 + $0x30] sm:$0xff]  ;;  %v41_v2 = vld [vmem:[%s1350_s2 + $0x28] sm:$0xff]  ;;  %1077 = vset.pattern.permute.xlu0 %v1096_v27  ;;  %1078 = vset.pattern.permute.xlu1 %v1097_v40  ;;  %vm461_vm5 = vcmask 130048   ;;  %vm571_vm12 = vcmask 261120  }
   0x2   :  { %961 = vmatprep.subr.mxu0 %v43_v0  ;;  %v1161_v3 = vld [vmem:[%s1351_s0] sm:$0xff]  ;;  %v140_v4 = vld [vmem:[%s1352_s5 + $0x38] sm:$0xff]  ;;  %v139_v6 = vld [vmem:[%s1352_s5 + $0x30] sm:$0xff]  ;;  %v446_v47 = vshrl.u32 %v445_v45, 7 }
   0x3   :  { %962 = vmatpush3.msra.mxu0 %v43_v0  ;;  %977 = vmatprep.mubr.msk.f32.mxu0 %vm51_vm0, %v1161_v3  ;;  %v40_v5 = vld [vmem:[%s1350_s2 + $0x20] sm:$0xff]  ;;  %v138_v7 = vld [vmem:[%s1352_s5 + $0x28] sm:$0xff]  ;;  %v39_v8 = vld [vmem:[%s1350_s2 + $0x18] sm:$0xff] }
   0x4   :  { %963 = vmatprep.subr.mxu0 %v42_v1  ;;  %980 = vmatprep.subr.mxu1 %v140_v4  ;;  %v137_v9 = vld [vmem:[%s1352_s5 + $0x20] sm:$0xff]  ;;  %v38_v10 = vld [vmem:[%s1350_s2 + $0x10] sm:$0xff]  ;;  %v136_v11 = vld [vmem:[%s1352_s5 + $0x18] sm:$0xff]  ;;  %v447_v50 = vsub.s32 0, %v446_v47  ;;  %v665_v51 = vsub.s32 1, %v446_v47 }
   0x5   :  { %964 = vmatpush3.msra.mxu0 %v42_v1  ;;  %981 = vmatpush3.msra.mxu1 %v140_v4  ;;  %v37_v12 = vld [vmem:[%s1350_s2 + $0x8] sm:$0xff]  ;;  %v135_v13 = vld [vmem:[%s1352_s5 + $0x10] sm:$0xff]  ;;  %v36_v14 = vld [vmem:[%s1350_s2] sm:$0xff] }
   0x6   :  { %965 = vmatprep.subr.mxu0 %v41_v2  ;;  %982 = vmatprep.subr.mxu1 %v139_v6  ;;  %v1201_v15 = vld [vmem:[%s1351_s0 + $0x8] sm:$0xff]  ;;  %v229_v16 = vld [vmem:[%s1353_s4 + $0x38] sm:$0xff]  ;;  %v228_v17 = vld [vmem:[%s1353_s4 + $0x30] sm:$0xff] }
   0x7   :  { %966 = vmatpush3.msra.mxu0 %v41_v2  ;;  %983 = vmatpush3.msra.mxu1 %v139_v6  ;;  %v227_v18 = vld [vmem:[%s1353_s4 + $0x28] sm:$0xff]  ;;  %v226_v19 = vld [vmem:[%s1353_s4 + $0x20] sm:$0xff]  ;;  %v225_v20 = vld [vmem:[%s1353_s4 + $0x18] sm:$0xff] }
   0x8   :  { %967 = vmatprep.subr.mxu0 %v40_v5  ;;  %984 = vmatprep.subr.mxu1 %v138_v7  ;;  %v224_v21 = vld [vmem:[%s1353_s4 + $0x10] sm:$0xff]  ;;  %v134_v22 = vld [vmem:[%s1352_s5 + $0x8] sm:$0xff]  ;;  %v133_v24 = vld [vmem:[%s1352_s5] sm:$0xff] }
   0x9   :  { %968 = vmatpush3.msra.mxu0 %v40_v5  ;;  %985 = vmatpush3.msra.mxu1 %v138_v7  ;;  %v223_v23 = vld [vmem:[%s1353_s4 + $0x8] sm:$0xff]  ;;  %v222_v25 = vld [vmem:[%s1353_s4] sm:$0xff]  ;;  %v344_v26 = vld [vmem:[%s1354_s6 + $0x38] sm:$0xff] }
   0xa   :  { %969 = vmatprep.subr.mxu0 %v39_v8  ;;  %986 = vmatprep.subr.mxu1 %v137_v9  ;;  %v883_v29 = vld [vmem:[%s1355_s3] ss:$0 sm:$0xff]  ;;  %v343_v33 = vld [vmem:[%s1354_s6 + $0x30] sm:$0xff]  ;;  %v342_v34 = vld [vmem:[%s1354_s6 + $0x28] sm:$0xff] }
   0xb   :  { %970 = vmatpush3.msra.mxu0 %v39_v8  ;;  %987 = vmatpush3.msra.mxu1 %v137_v9  ;;  %v341_v35 = vld [vmem:[%s1354_s6 + $0x20] sm:$0xff]  ;;  %v340_v36 = vld [vmem:[%s1354_s6 + $0x18] sm:$0xff]  ;;  %v339_v37 = vld [vmem:[%s1354_s6 + $0x10] sm:$0xff] }
   0xc   :  { %971 = vmatprep.subr.mxu0 %v38_v10  ;;  %988 = vmatprep.subr.mxu1 %v136_v11  ;;  %v338_v38 = vld [vmem:[%s1354_s6 + $0x8] sm:$0xff]  ;;  %v337_v39 = vld [vmem:[%s1354_s6] sm:$0xff] }
   0xd   :  { %972 = vmatpush3.msra.mxu0 %v38_v10  ;;  %989 = vmatpush3.msra.mxu1 %v136_v11  ;;  %v35_v55 = vld [vmem:[%s1356_s1 + $0x8] sm:$0xff]  ;;  %v1288_v56 = vld [vmem:[%s1356_s1] sm:$0xff]  ;;  %s1098_s1 = smov 96  }
   0xe   :  { %973 = vmatprep.subr.mxu0 %v37_v12  ;;  %990 = vmatprep.subr.mxu1 %v135_v13  ;;  %vm458_vm1 = vcmp.gt.f32.partialorder %v35_v55, 0.0  ;;  %vm457_vm2 = vcmp.gt.f32.partialorder %v1288_v56, 0.0 }
   0xf   :  { %974 = vmatpush3.msra.mxu0 %v37_v12  ;;  %991 = vmatpush3.msra.mxu1 %v135_v13 }
  0x10   :  { %975 = vmatprep.subr.mxu0 %v36_v14  ;;  %992 = vmatprep.subr.mxu1 %v134_v22 }
  0x11   :  { %976 = vmatpush3.msra.mxu0 %v36_v14  ;;  %993 = vmatpush3.msra.mxu1 %v134_v22 }
  0x12   :  { %978 = vmatmul.mubr.msk.f32.vlgmr.msra.gmra.mxu0 %vm51_vm0, %v1201_v15  ;;  %999 = vmatprep.subr.mxu0 %v229_v16 }
  0x13   :  { %1000 = vmatpush3.msra.mxu0 %v229_v16  ;;  %994 = vmatprep.subr.mxu1 %v133_v24 }
  0x14   :  { %1001 = vmatprep.subr.mxu0 %v228_v17  ;;  %995 = vmatpush3.msra.mxu1 %v133_v24 }
  0x15   :  { %1002 = vmatpush3.msra.mxu0 %v228_v17  ;;  %1018 = vmatprep.subr.mxu1 %v344_v26 }
  0x16   :  { %1003 = vmatprep.subr.mxu0 %v227_v18 }
  0x17   :  { %1004 = vmatpush3.msra.mxu0 %v227_v18 }
  0x18   :  { %1005 = vmatprep.subr.mxu0 %v226_v19 }
  0x19   :  { %1006 = vmatpush3.msra.mxu0 %v226_v19 }
  0x1a   :  { %1007 = vmatprep.subr.mxu0 %v225_v20 }
  0x1b   :  { %1008 = vmatpush3.msra.mxu0 %v225_v20 }
  0x1c   :  { %1009 = vmatprep.subr.mxu0 %v224_v21 }
  0x1d   :  { %1010 = vmatpush3.msra.mxu0 %v224_v21 }
  0x1e   :  { %1011 = vmatprep.subr.mxu0 %v223_v23 }
  0x1f   :  { %1012 = vmatpush3.msra.mxu0 %v223_v23 }
  0x20   :  { %1013 = vmatprep.subr.mxu0 %v222_v25 }
  0x21   :  { %1014 = vmatpush3.msra.mxu0 %v222_v25 }
  0xd2   :  { %v979_v28 = vpop.f32.mrf.mxu0 }
  0xd3   :  { %v1243_v32 = vadd.f32 %v979_v28, %v883_v29 }
  0xd4   :  { %v124_v30 = vpop.f32.mrf.mxu0 }
  0xd5   :  { %v1241_v31 = vadd.f32 %v883_v29, %v124_v30 }
  0xd7   :  { %996 = vmatprep.mubr.msk.f32.mxu1 %vm51_vm0, %v1241_v31  ;;  %1015 = vmatprep.mubr.msk.f32.mxu0 %vm51_vm0, %v1241_v31 }
  0xd8   :  { %997 = vmatmul.mubr.msk.f32.vlgmr.msra.gmra.mxu1 %vm51_vm0, %v1243_v32  ;;  %1016 = vmatmul.mubr.msk.f32.vlgmr.msra.gmra.mxu0 %vm51_vm0, %v1243_v32 }
  0xd9   :  { %1019 = vmatpush3.msra.mxu1 %v344_v26  ;;  %1034 = vmatprep.mubr.msk.f32.mxu1 %vm51_vm0, %v1161_v3 }
  0xda   :  { %1020 = vmatprep.subr.mxu1 %v343_v33 }
  0xdb   :  { %1021 = vmatpush3.msra.mxu1 %v343_v33 }
  0xdc   :  { %1022 = vmatprep.subr.mxu1 %v342_v34 }
  0xdd   :  { %1023 = vmatpush3.msra.mxu1 %v342_v34 }
  0xde   :  { %1024 = vmatprep.subr.mxu1 %v341_v35 }
  0xdf   :  { %1025 = vmatpush3.msra.mxu1 %v341_v35 }
  0xe0   :  { %1026 = vmatprep.subr.mxu1 %v340_v36 }
  0xe1   :  { %1027 = vmatpush3.msra.mxu1 %v340_v36 }
  0xe2   :  { %1028 = vmatprep.subr.mxu1 %v339_v37 }
  0xe3   :  { %1029 = vmatpush3.msra.mxu1 %v339_v37 }
  0xe4   :  { %1030 = vmatprep.subr.mxu1 %v338_v38 }
  0xe5   :  { %1031 = vmatpush3.msra.mxu1 %v338_v38 }
  0xe6   :  { %1032 = vmatprep.subr.mxu1 %v337_v39 }
  0xe7   :  { %1033 = vmatpush3.msra.mxu1 %v337_v39 }
  0xe8   :  { %1037 = vmatprep.subr.mxu1 %v1243_v32  ;;  %1035 = vmatmul.mubr.msk.f32.vlgmr.msra.gmra.mxu1 %vm51_vm0, %v1201_v15 }
  0xe9   :  { %1038 = vmatpush3.msra.mxu1 %v1243_v32 }
  0xea   :  { %1039 = vmatprep.subr.mxu1 %v1241_v31 }
  0xeb   :  { %1040 = vmatpush3.msra.mxu1 %v1241_v31 }
 0x198   :  { %v998_v41 = vpop.f32.mrf.mxu1  ;;  %v1017_v43 = vpop.f32.mrf.mxu0 }
 0x199   :  { %442 = vperm.xlu0 %1077, %v998_v41  }
 0x19a   :  { %v213_v42 = vpop.f32.mrf.mxu1  ;;  %v296_v44 = vpop.f32.mrf.mxu0 }
 0x19b   :  { %656 = vperm.xlu1 %1078, %v213_v42  }
 0x19d   :  { %437 = vperm.xlu0 %1077, %v213_v42  }
 0x19f   :  { %660 = vperm.xlu1 %1078, %v998_v41  }
 0x1bb   :  { %305 = vxpose.xlu0.b32.start [1/2] (short) (narrow) %v296_v44, 8 }
 0x1bf   :  { %306 = vxpose.xlu0.b32.end [2/2] (short) (narrow) %v1017_v43, 8 }
 0x1e8   :  { %1079 = vset.pattern.permute.xlu0 %v1097_v40  ;;  %v430_v40 = vld [vmem:[%s1357_s7 + $0x18] sm:$0xff] }
 0x1e9   :  { %1044 = vmatprep.subr.mxu1 %v430_v40 }
 0x214   :  { %v443_v46 = vpop.permute.xlu0 %442 }
 0x216   :  { %v657_v48 = vpop.permute.xlu1 %656 }
 0x218   :  { %v438_v49 = vpop.permute.xlu0 %437 }
 0x21a   :  { %v661_v57 = vpop.permute.xlu1 %660 }
 0x237   :  { %v321_v52 = vpop.trf.xlu0 }
 0x238   :  { %v448_v53 = vrot.slane %v321_v52, %v447_v50  ;;  %v666_v54 = vrot.slane %v321_v52, %v665_v51 }
 0x23a   :  { %v449_v58 = vadd.f32 %v448_v53, %v438_v49  ;;  %v450_v59 = vadd.f32 %v448_v53, %v443_v46  ;;  %v667_v60 = vadd.f32 %v666_v54, %v657_v48  ;;  %v668_v61 = vadd.f32 %v666_v54, %v661_v57  ;;  %v429_v54 = vld [vmem:[%s1357_s7 + $0x10] sm:$0xff] }
 0x23c   :  { %vm452_vm3 = vcmp.gt.f32.partialorder %v450_v59, 0.0  ;;  %v454_v62 = vmul.f32 0.2, %v450_v59  ;;  %vm451_vm4 = vcmp.gt.f32.partialorder %v449_v58, 0.0  ;;  %v453_v63 = vmul.f32 0.2, %v449_v58 }
 0x23d   :  { %vm669_vm6 = vcmp.gt.f32.partialorder %v667_v60, 0.0  ;;  %v671_v0 = vmul.f32 0.2, %v667_v60  ;;  %v672_v3 = vmul.f32 0.2, %v668_v61  ;;  %vm670_vm7 = vcmp.gt.f32.partialorder %v668_v61, 0.0 }
 0x23e   :  { %v456_v1 = vsel %vm452_vm3, %v450_v59, %v454_v62  ;;  %v455_v2 = vsel %vm451_vm4, %v449_v58, %v453_v63  ;;  %v428_v58 = vld [vmem:[%s1357_s7 + $0x8] sm:$0xff]  ;;  %v434_v59 = vld [vmem:[%s1357_s7 + $0x38] sm:$0xff]  ;;  %v431_v63 = vld [vmem:[%s1357_s7 + $0x20] sm:$0xff] }
 0x23f   :  { %v460_v4 = vsel %vm458_vm1, %v456_v1, -1e+30  ;;  %v459_v5 = vsel %vm457_vm2, %v455_v2, -1e+30  ;;  %v673_v6 = vsel %vm669_vm6, %v667_v60, %v671_v0  ;;  %v674_v10 = vsel %vm670_vm7, %v668_v61, %v672_v3  ;;  %v427_v60 = vld [vmem:[%s1357_s7] sm:$0xff]  ;;  %v433_v61 = vld [vmem:[%s1357_s7 + $0x30] sm:$0xff]  ;;  %v1036_v0 = vpop.f32.mrf.mxu1 }
 0x240   :  { %v465_v7 = vsel %vm461_vm5, %v460_v4, -inf  ;;  %v462_v8 = vsel %vm461_vm5, %v459_v5, -inf  ;;  %v675_v9 = vsel %vm457_vm2, %v673_v6, -1e+30  ;;  %v676_v12 = vsel %vm458_vm1, %v674_v10, -1e+30 }
 0x241   :  { %466 = vmax.xlane.f32.xlu0 %v465_v7  ;;  %463 = vmax.xlane.f32.xlu1 %v462_v8  ;;  %v677_v11 = vsel %vm461_vm5, %v675_v9, -inf  ;;  %v680_v13 = vsel %vm461_vm5, %v676_v12, -inf  ;;  %v432_v62 = vld [vmem:[%s1357_s7 + $0x28] sm:$0xff]  ;;  %v418_v1 = vpop.f32.mrf.mxu1  ;;  %v890_v6 = vld [vmem:[%s1358_s8] ss:$0 sm:$0xff] }
 0x242   :  { %v424_v8 = vadd.f32 %v1036_v0, %v890_v6  ;;  %v419_v10 = vadd.f32 %v890_v6, %v418_v1 }
 0x245   :  { %678 = vmax.xlane.f32.xlu1 %v677_v11 }
 0x249   :  { %681 = vmax.xlane.f32.xlu1 %v680_v13 }
 0x25a   :  { %707 = vrot.lane.b32.xlu1 %v1243_v32, %s1098_s1 }
 0x2ca   :  { %v467_v14 = vpop.xlane.xlu0 %466  ;;  %v464_v15 = vpop.xlane.xlu1 %463 }
 0x2cb   :  { %v469_v16 = vsub.f32 %v460_v4, %v467_v14  ;;  %v468_v18 = vsub.f32 %v459_v5, %v464_v15 }
 0x2cd   :  { %v472_v17 = vmul.f32 1.442695, %v469_v16  ;;  %v470_v20 = vmul.f32 1.442695, %v468_v18 }
 0x2ce   :  { %v679_v19 = vpop.xlane.xlu1 %678 }
 0x2cf   :  { %1080 = vpow2.f32 %v472_v17  ;;  %v683_v22 = vsub.f32 %v675_v9, %v679_v19 }
 0x2d0   :  { %1082 = vpow2.f32 %v470_v20 }
 0x2d1   :  { %v685_v26 = vmul.f32 1.442695, %v683_v22 }
 0x2d2   :  { %v682_v21 = vpop.xlane.xlu1 %681 }
 0x2d3   :  { %v684_v23 = vsub.f32 %v676_v12, %v682_v21 }
 0x2d5   :  { %v687_v24 = vmul.f32 1.442695, %v684_v23 }
 0x2d6   :  { %v708_v25 = vpop.permute.xlu1 %707 }
 0x2d7   :  { %1084 = vpow2.f32 %v687_v24  ;;  %1055 = vmatprep.subr.mxu0 %v708_v25 }
 0x2d8   :  { %1056 = vmatpush3.msra.mxu0 %v708_v25  ;;  %1086 = vpow2.f32 %v685_v26 }
 0x2dc   :  { %v1081_v27 = vpop.eup %1080 }
 0x2dd   :  { %v475_v28 = vmul.f32 %v1081_v27, %v35_v55  ;;  %v1083_v30 = vpop.eup %1082 }
 0x2de   :  { %v474_v35 = vmul.f32 %v1083_v30, %v1288_v56 }
 0x2df   :  { %v479_v29 = vsel %vm461_vm5, %v475_v28, 0.0 }
 0x2e0   :  { %480 = vadd.xlane.f32.xlu1 %v479_v29  ;;  %v476_v37 = vsel %vm461_vm5, %v474_v35, 0.0 }
 0x2e4   :  { %v1085_v32 = vpop.eup %1084 }
 0x2e5   :  { %v690_v33 = vmul.f32 %v1085_v32, %v35_v55  ;;  %v1087_v36 = vpop.eup %1086 }
 0x2e6   :  { %v689_v38 = vmul.f32 %v1087_v36, %v1288_v56 }
 0x2e7   :  { %v694_v34 = vsel %vm461_vm5, %v690_v33, 0.0 }
 0x2e8   :  { %695 = vadd.xlane.f32.xlu1 %v694_v34  ;;  %v691_v39 = vsel %vm461_vm5, %v689_v38, 0.0 }
 0x2ec   :  { %477 = vadd.xlane.f32.xlu1 %v476_v37 }
 0x2f0   :  { %692 = vadd.xlane.f32.xlu1 %v691_v39 }
 0x301   :  { %705 = vrot.lane.b32.xlu1 %v1241_v31, %s1098_s1 }
 0x369   :  { %v481_v41 = vpop.xlane.xlu1 %480 }
 0x36a   :  { %vm483_vm8 = vcmp.gt.f32.partialorder %v481_v41, 0.0 }
 0x36b   :  { %v485_v43 = vsel %vm483_vm8, %v481_v41, 1.0 }
 0x36c   :  { %1088 = vrcp.f32 %v485_v43 }
 0x371   :  { %v696_v42 = vpop.xlane.xlu1 %695 }
 0x372   :  { %vm698_vm9 = vcmp.gt.f32.partialorder %v696_v42, 0.0 }
 0x373   :  { %v700_v46 = vsel %vm698_vm9, %v696_v42, 1.0 }
 0x375   :  { %v478_v44 = vpop.xlane.xlu1 %477 }
 0x376   :  { %vm482_vm10 = vcmp.gt.f32.partialorder %v478_v44, 0.0 }
 0x377   :  { %v484_v45 = vsel %vm482_vm10, %v478_v44, 1.0 }
 0x378   :  { %1090 = vrcp.f32 %v484_v45 }
 0x379   :  { %v693_v47 = vpop.xlane.xlu1 %692  ;;  %1092 = vrcp.f32 %v700_v46  ;;  %v1089_v49 = vpop.eup %1088 }
 0x37a   :  { %vm697_vm11 = vcmp.gt.f32.partialorder %v693_v47, 0.0  ;;  %v489_v52 = vmul.f32 %v1089_v49, %v475_v28 }
 0x37b   :  { %v699_v31 = vsel %vm697_vm11, %v693_v47, 1.0 }
 0x37c   :  { %1094 = vrcp.f32 %v699_v31 }
 0x37d   :  { %v706_v48 = vpop.permute.xlu1 %705 }
 0x37e   :  { %1057 = vmatprep.subr.mxu0 %v706_v48 }
 0x37f   :  { %1058 = vmatpush3.msra.mxu0 %v706_v48 }
 0x380   :  { %1062 = vmatprep.subr.mxu0 %v434_v59 }
 0x385   :  { %v1091_v50 = vpop.eup %1090 }
 0x386   :  { %v488_v51 = vmul.f32 %v1091_v50, %v474_v35  ;;  %v1093_v53 = vpop.eup %1092 }
 0x387   :  { %v704_v57 = vmul.f32 %v1093_v53, %v690_v33 }
 0x388   :  { %1041 = vmatprep.mubr.msk.f32.mxu1 %vm461_vm5, %v488_v51 }
 0x389   :  { %v1095_v55 = vpop.eup %1094  ;;  %1042 = vmatmul.mubr.msk.f32.vlgmr.msra.gmra.mxu1 %vm461_vm5, %v489_v52 }
 0x38a   :  { %v703_v56 = vmul.f32 %v1095_v55, %v689_v38  ;;  %1045 = vmatpush3.msra.mxu1 %v430_v40 }
 0x38b   :  { %1046 = vmatprep.subr.mxu1 %v429_v54 }
 0x38c   :  { %1059 = vmatprep.mubr.msk.f32.mxu0 %vm461_vm5, %v703_v56  ;;  %1047 = vmatpush3.msra.mxu1 %v429_v54 }
 0x38d   :  { %1060 = vmatmul.mubr.msk.f32.vlgmr.msra.gmra.mxu0 %vm461_vm5, %v704_v57  ;;  %1048 = vmatprep.subr.mxu1 %v428_v58 }
 0x38e   :  { %1049 = vmatpush3.msra.mxu1 %v428_v58  ;;  %1063 = vmatpush3.msra.mxu0 %v434_v59 }
 0x38f   :  { %1050 = vmatprep.subr.mxu1 %v427_v60  ;;  %1064 = vmatprep.subr.mxu0 %v433_v61 }
 0x390   :  { %1051 = vmatpush3.msra.mxu1 %v427_v60  ;;  %1065 = vmatpush3.msra.mxu0 %v433_v61 }
 0x391   :  { %1066 = vmatprep.subr.mxu0 %v432_v62 }
 0x392   :  { %1067 = vmatpush3.msra.mxu0 %v432_v62 }
 0x393   :  { %1068 = vmatprep.subr.mxu0 %v431_v63 }
 0x394   :  { %1069 = vmatpush3.msra.mxu0 %v431_v63 }
 0x449   :  { %v1043_v2 = vpop.f32.mrf.mxu1 }
 0x44b   :  { %v562_v3 = vpop.f32.mrf.mxu1 }
 0x44c   :  { %1052 = vmatprep.mubr.msk.f32.mxu1 %vm571_vm12, %v562_v3 }
 0x44d   :  { %1053 = vmatmul.mubr.msk.f32.vlgmr.msra.gmra.mxu1 %vm571_vm12, %v1043_v2  ;;  %v1061_v4 = vpop.f32.mrf.mxu0 }
 0x44f   :  { %v783_v5 = vpop.f32.mrf.mxu0 }
 0x450   :  { %1070 = vmatprep.mubr.msk.f32.mxu0 %vm571_vm12, %v783_v5 }
 0x451   :  { %1071 = vmatmul.mubr.msk.f32.vlgmr.msra.gmra.mxu0 %vm571_vm12, %v1061_v4 }
 0x50d   :  { %v1054_v7 = vpop.f32.mrf.mxu1 }
 0x50e   :  { %v654_v11 = vadd.f32 %v1054_v7, %v424_v8 }
 0x50f   :  { %v644_v9 = vpop.f32.mrf.mxu1 }
 0x510   :  { %v653_v13 = vadd.f32 %v644_v9, %v419_v10 }
 0x511   :  { %v1072_v12 = vpop.f32.mrf.mxu0 }
 0x512   :  { %v874_v14 = vadd.f32 %v1072_v12, %v654_v11 }
 0x513   :  { %v864_v15 = vpop.f32.mrf.mxu0 }
 0x514   :  { %v876_v16 = vmax.f32 %v874_v14, 0.0  ;;  %v873_v17 = vadd.f32 %v864_v15, %v653_v13 }
 0x516   :  { %878 = vst.msk [vmem:[%s1359_s9 + $0x8] sm:$0xff] %vm51_vm0, %v876_v16  ;;  %v875_v18 = vmax.f32 %v873_v17, 0.0 }
 0x518   :  { %877 = vst.msk [vmem:[%s1359_s9] sm:$0xff] %vm51_vm0, %v875_v18 }

</bundles_post_ra>
